<compile_context>
chip_gen: v6e
topology: v6e:2x2x1
jax: 0.10.0
libtpu: 0.0.40
codegen_flags: <defaults>
</compile_context>

<pallas_src>
import math
import jax
import jax.numpy as jnp
from jax.experimental import pallas as pl
from jax.experimental.pallas import tpu as pltpu

K_IN = 28 * 28        # 784
K_PAD = 896           # 7 * 128: lane-aligned contraction dim for fc1
H1 = 512
H2 = 128
N_OUT = 10
N_PAD = 128           # lane-dense fc3 / output width
NEG_BIG = -1e30       # padded-class bias -> exp underflows to exactly 0


def mlp_kernel(x_ref, w1_ref, b1_ref, w2_ref, b2_ref, w3_ref, b3_ref, o_ref):
    # x tile: [TB, 896] bf16. Weights are bf16 and VMEM-resident across grid
    # steps. Biases / activations stay f32 (v5e-safe); MXU accumulates in f32.
    x = x_ref[...]

    # fc1 + relu
    h1 = jnp.dot(x, w1_ref[...], preferred_element_type=jnp.float32) + b1_ref[...]
    h1 = jnp.maximum(h1, 0.0)                                        # [TB, 512] f32

    # fc2 + relu
    h2 = jnp.dot(h1.astype(jnp.bfloat16), w2_ref[...],
                 preferred_element_type=jnp.float32) + b2_ref[...]
    h2 = jnp.maximum(h2, 0.0)                                        # [TB, 128] f32

    # fc3 (padded to 128 classes) + softmax(dim=1)
    logits = jnp.dot(h2.astype(jnp.bfloat16), w3_ref[...],
                     preferred_element_type=jnp.float32) + b3_ref[...]
    # Padded logit columns carry a -1e30 bias -> exp underflows to 0, so the
    # softmax over 128 lanes equals softmax over the real 10 classes.
    m = jnp.max(logits, axis=-1, keepdims=True)
    e = jnp.exp(logits - m)
    denom = jnp.sum(e, axis=-1, keepdims=True)
    o_ref[...] = (e * pl.reciprocal(denom, approx=True)).astype(o_ref.dtype)


def _round_up(x, m):
    return (x + m - 1) // m * m


def mlp_forward(x_nchw, params, *, tb=256):
    w1, b1, w2, b2, w3, b3 = params
    B = x_nchw.shape[0]

    x = x_nchw.reshape(B, K_IN).astype(jnp.float32)            # x.view(-1, 784)
    x = jnp.pad(x, ((0, 0), (0, K_PAD - K_IN)))                # K -> 896 (zeros)

    TB = min(tb, _round_up(B, 16))                             # bf16-sublane-aligned tile
    Bp = _round_up(B, TB)
    if Bp != B:
        x = jnp.pad(x, ((0, Bp - B), (0, 0)))
    x = x.astype(jnp.bfloat16)

    resident = lambda i: (0, 0)     # weights/biases: same block every step -> VMEM-resident
    out = pl.pallas_call(
        mlp_kernel,
        out_shape=jax.ShapeDtypeStruct((Bp, N_PAD), jnp.float32),
        grid=(Bp // TB,),
        in_specs=[
            pl.BlockSpec((TB, K_PAD), lambda i: (i, 0)),       # x batch tile
            pl.BlockSpec((K_PAD, H1), resident),               # W1 (bf16)
            pl.BlockSpec((1, H1), resident),                   # b1 (f32)
            pl.BlockSpec((H1, H2), resident),                  # W2 (bf16)
            pl.BlockSpec((1, H2), resident),                   # b2 (f32)
            pl.BlockSpec((H2, N_PAD), resident),               # W3 (bf16, cols padded)
            pl.BlockSpec((1, N_PAD), resident),                # b3 (f32, -1e30 pad)
        ],
        out_specs=pl.BlockSpec((TB, N_PAD), lambda i: (i, 0)), # lane-dense store
        compiler_params=pltpu.CompilerParams(
            dimension_semantics=("parallel",)),                # v7x: split batch over 2 TCs
    )(x, w1, b1, w2, b2, w3, b3)

    return out[:B, :N_OUT]


def init_params(key):
    """nn.Linear-style init U(-1/sqrt(fan_in), 1/sqrt(fan_in)); weights stored as
    [in, out] (transpose of torch layout), pre-padded and cast to bf16 once."""
    dims = [(K_IN, H1), (H1, H2), (H2, N_OUT)]
    keys = jax.random.split(key, 2 * len(dims))
    ws, bs = [], []
    for i, (fan_in, fan_out) in enumerate(dims):
        bound = 1.0 / math.sqrt(fan_in)
        w = jax.random.uniform(keys[2 * i], (fan_in, fan_out),
                               minval=-bound, maxval=bound, dtype=jnp.float32)
        b = jax.random.uniform(keys[2 * i + 1], (1, fan_out),
                               minval=-bound, maxval=bound, dtype=jnp.float32)
        ws.append(w)
        bs.append(b)
    w1, w2, w3 = ws
    b1, b2, b3 = bs
    # One-time layout padding (zero rows/cols are exact no-ops on the math).
    w1 = jnp.pad(w1, ((0, K_PAD - K_IN), (0, 0)))              # 784 -> 896 contraction
    w3 = jnp.pad(w3, ((0, 0), (0, N_PAD - N_OUT)))             # 10  -> 128 classes
    b3 = jnp.pad(b3, ((0, 0), (0, N_PAD - N_OUT)), constant_values=NEG_BIG)
    # bf16 weights (halve weight DMA bytes); biases stay f32.
    return (w1.astype(jnp.bfloat16), b1,
            w2.astype(jnp.bfloat16), b2,
            w3.astype(jnp.bfloat16), b3)


def mlp_ref(x_nchw, params):
    """Pure-JAX reference using the same bf16 operands / f32 accumulation."""
    w1, b1, w2, b2, w3, b3 = params
    B = x_nchw.shape[0]
    x = x_nchw.reshape(B, K_IN).astype(jnp.float32)
    x = jnp.pad(x, ((0, 0), (0, K_PAD - K_IN))).astype(jnp.bfloat16)
    h1 = jnp.maximum(jnp.dot(x, w1, preferred_element_type=jnp.float32) + b1, 0.0)
    h2 = jnp.maximum(jnp.dot(h1.astype(jnp.bfloat16), w2,
                             preferred_element_type=jnp.float32) + b2, 0.0)
    logits = jnp.dot(h2.astype(jnp.bfloat16), w3,
                     preferred_element_type=jnp.float32) + b3
    return jax.nn.softmax(logits[:, :N_OUT], axis=-1)


if __name__ == "__main__":
    key = jax.random.PRNGKey(0)
    k_x, k_p = jax.random.split(key)

    B = 8
    x = jax.random.normal(k_x, (B, 1, 28, 28), dtype=jnp.float32)    # NCHW input
    params = init_params(k_p)

    out = mlp_forward(x, params)
    jax.block_until_ready(out)

    assert out.shape == (B, N_OUT)
    # softmax rows sum to 1 (approx reciprocal has ~2^-12 relative error)
    assert bool(jnp.allclose(jnp.sum(out, axis=1), 1.0, atol=5e-3))
    # matches the pure-JAX reference
    ref = mlp_ref(x, params)
    assert bool(jnp.allclose(out, ref, atol=1e-2, rtol=1e-2))

    print("KERNEL_OK")
</pallas_src>

<mosaic_0001>
module attributes {stable_mosaic.version = 11 : i64} {
  func.func @mlp_kernel(%arg0: i32, %arg1: memref<16x896xbf16, #tpu.memory_space<vmem>>, %arg2: memref<896x512xbf16, #tpu.memory_space<vmem>>, %arg3: memref<1x512xf32, #tpu.memory_space<vmem>>, %arg4: memref<512x128xbf16, #tpu.memory_space<vmem>>, %arg5: memref<1x128xf32, #tpu.memory_space<vmem>>, %arg6: memref<128x128xbf16, #tpu.memory_space<vmem>>, %arg7: memref<1x128xf32, #tpu.memory_space<vmem>>, %arg8: memref<16x128xf32, #tpu.memory_space<vmem>>) attributes {dimension_semantics = [#tpu.dimension_semantics<parallel>], iteration_bounds = array<i64: 1>, scalar_prefetch = 0 : i64, scratch_operands = 0 : i64, tpu.core_type = #tpu.core_type<tc>, window_params = [{transform_indices = @transform_0, window_bounds = array<i64: 16, 896>}, {pipeline_mode = #tpu.pipeline_mode<synchronous>, transform_indices = @transform_1, window_bounds = array<i64: 896, 512>}, {pipeline_mode = #tpu.pipeline_mode<synchronous>, transform_indices = @transform_2, window_bounds = array<i64: 1, 512>}, {pipeline_mode = #tpu.pipeline_mode<synchronous>, transform_indices = @transform_3, window_bounds = array<i64: 512, 128>}, {pipeline_mode = #tpu.pipeline_mode<synchronous>, transform_indices = @transform_4, window_bounds = array<i64: 1, 128>}, {pipeline_mode = #tpu.pipeline_mode<synchronous>, transform_indices = @transform_5, window_bounds = array<i64: 128, 128>}, {pipeline_mode = #tpu.pipeline_mode<synchronous>, transform_indices = @transform_6, window_bounds = array<i64: 1, 128>}, {transform_indices = @transform_7, window_bounds = array<i64: 16, 128>}]} {
    %c0 = arith.constant 0 : index
    %c0_0 = arith.constant 0 : index
    %0 = vector.load %arg1[%c0, %c0_0] : memref<16x896xbf16, #tpu.memory_space<vmem>>, vector<16x896xbf16>
    %c0_1 = arith.constant 0 : index
    %c0_2 = arith.constant 0 : index
    %1 = vector.load %arg2[%c0_1, %c0_2] : memref<896x512xbf16, #tpu.memory_space<vmem>>, vector<896x512xbf16>
    %cst = arith.constant dense<0.000000e+00> : vector<16x512xf32>
    %2 = tpu.matmul %0, %1, %cst {dimension_numbers = #tpu.dot_dimension_numbers<[1], [0], [0], [1], [0, 0, 1, 1], [], []>} : vector<16x896xbf16>, vector<896x512xbf16>, vector<16x512xf32> -> vector<16x512xf32>
    %c0_3 = arith.constant 0 : index
    %c0_4 = arith.constant 0 : index
    %3 = vector.load %arg3[%c0_3, %c0_4] : memref<1x512xf32, #tpu.memory_space<vmem>>, vector<1x512xf32>
    %4 = vector.broadcast %3 : vector<1x512xf32> to vector<16x512xf32>
    %5 = arith.addf %2, %4 : vector<16x512xf32>
    %cst_5 = arith.constant 0.000000e+00 : f32
    %6 = vector.broadcast %cst_5 : f32 to vector<16x512xf32>
    %7 = arith.maximumf %5, %6 : vector<16x512xf32>
    %8 = arith.truncf %7 : vector<16x512xf32> to vector<16x512xbf16>
    %c0_6 = arith.constant 0 : index
    %c0_7 = arith.constant 0 : index
    %9 = vector.load %arg4[%c0_6, %c0_7] : memref<512x128xbf16, #tpu.memory_space<vmem>>, vector<512x128xbf16>
    %cst_8 = arith.constant dense<0.000000e+00> : vector<16x128xf32>
    %10 = tpu.matmul %8, %9, %cst_8 {dimension_numbers = #tpu.dot_dimension_numbers<[1], [0], [0], [1], [0, 0, 1, 1], [], []>} : vector<16x512xbf16>, vector<512x128xbf16>, vector<16x128xf32> -> vector<16x128xf32>
    %c0_9 = arith.constant 0 : index
    %c0_10 = arith.constant 0 : index
    %11 = vector.load %arg5[%c0_9, %c0_10] : memref<1x128xf32, #tpu.memory_space<vmem>>, vector<1x128xf32>
    %12 = vector.broadcast %11 : vector<1x128xf32> to vector<16x128xf32>
    %13 = arith.addf %10, %12 : vector<16x128xf32>
    %cst_11 = arith.constant 0.000000e+00 : f32
    %14 = vector.broadcast %cst_11 : f32 to vector<16x128xf32>
    %15 = arith.maximumf %13, %14 : vector<16x128xf32>
    %16 = arith.truncf %15 : vector<16x128xf32> to vector<16x128xbf16>
    %c0_12 = arith.constant 0 : index
    %c0_13 = arith.constant 0 : index
    %17 = vector.load %arg6[%c0_12, %c0_13] : memref<128x128xbf16, #tpu.memory_space<vmem>>, vector<128x128xbf16>
    %cst_14 = arith.constant dense<0.000000e+00> : vector<16x128xf32>
    %18 = tpu.matmul %16, %17, %cst_14 {dimension_numbers = #tpu.dot_dimension_numbers<[1], [0], [0], [1], [0, 0, 1, 1], [], []>} : vector<16x128xbf16>, vector<128x128xbf16>, vector<16x128xf32> -> vector<16x128xf32>
    %c0_15 = arith.constant 0 : index
    %c0_16 = arith.constant 0 : index
    %19 = vector.load %arg7[%c0_15, %c0_16] : memref<1x128xf32, #tpu.memory_space<vmem>>, vector<1x128xf32>
    %20 = vector.broadcast %19 : vector<1x128xf32> to vector<16x128xf32>
    %21 = arith.addf %18, %20 : vector<16x128xf32>
    %cst_17 = arith.constant dense<0xFF800000> : vector<16xf32>
    %22 = vector.multi_reduction <maximumf>, %21, %cst_17 [1] : vector<16x128xf32> to vector<16xf32>
    %23 = vector.shape_cast %22 : vector<16xf32> to vector<16x1xf32>
    %24 = vector.broadcast %23 : vector<16x1xf32> to vector<16x128xf32>
    %25 = arith.subf %21, %24 : vector<16x128xf32>
    %26 = math.exp %25 : vector<16x128xf32>
    %cst_18 = arith.constant dense<0.000000e+00> : vector<16xf32>
    %27 = vector.multi_reduction <add>, %26, %cst_18 [1] : vector<16x128xf32> to vector<16xf32>
    %28 = vector.shape_cast %27 : vector<16xf32> to vector<16x1xf32>
    %29 = tpu.reciprocal %28 {approx = true} : vector<16x1xf32> -> vector<16x1xf32>
    %30 = vector.broadcast %29 : vector<16x1xf32> to vector<16x128xf32>
    %31 = arith.mulf %26, %30 : vector<16x128xf32>
    %c0_19 = arith.constant 0 : index
    %c0_20 = arith.constant 0 : index
    %32 = vector.load %arg8[%c0_19, %c0_20] : memref<16x128xf32, #tpu.memory_space<vmem>>, vector<16x128xf32>
    tpu.vector_store %arg8[%c0_19, %c0_20], %31 {strides = array<i32>} : memref<16x128xf32, #tpu.memory_space<vmem>>, vector<16x128xf32>,
    return
  }
  func.func @transform_0(%arg0: i32) -> (i32, i32) {
    %c0_i32 = arith.constant 0 : i32
    %c0_i32_0 = arith.constant 0 : i32
    return %arg0, %c0_i32 : i32, i32
  }
  func.func @transform_1(%arg0: i32) -> (i32, i32) {
    %c0_i32 = arith.constant 0 : i32
    %c0_i32_0 = arith.constant 0 : i32
    %c0_i32_1 = arith.constant 0 : i32
    return %c0_i32, %c0_i32_0 : i32, i32
  }
  func.func @transform_2(%arg0: i32) -> (i32, i32) {
    %c0_i32 = arith.constant 0 : i32
    %c0_i32_0 = arith.constant 0 : i32
    %c0_i32_1 = arith.constant 0 : i32
    return %c0_i32, %c0_i32_0 : i32, i32
  }
  func.func @transform_3(%arg0: i32) -> (i32, i32) {
    %c0_i32 = arith.constant 0 : i32
    %c0_i32_0 = arith.constant 0 : i32
    %c0_i32_1 = arith.constant 0 : i32
    return %c0_i32, %c0_i32_0 : i32, i32
  }
  func.func @transform_4(%arg0: i32) -> (i32, i32) {
    %c0_i32 = arith.constant 0 : i32
    %c0_i32_0 = arith.constant 0 : i32
    %c0_i32_1 = arith.constant 0 : i32
    return %c0_i32, %c0_i32_0 : i32, i32
  }
  func.func @transform_5(%arg0: i32) -> (i32, i32) {
    %c0_i32 = arith.constant 0 : i32
    %c0_i32_0 = arith.constant 0 : i32
    %c0_i32_1 = arith.constant 0 : i32
    return %c0_i32, %c0_i32_0 : i32, i32
  }
  func.func @transform_6(%arg0: i32) -> (i32, i32) {
    %c0_i32 = arith.constant 0 : i32
    %c0_i32_0 = arith.constant 0 : i32
    %c0_i32_1 = arith.constant 0 : i32
    return %c0_i32, %c0_i32_0 : i32, i32
  }
  func.func @transform_7(%arg0: i32) -> (i32, i32) {
    %c0_i32 = arith.constant 0 : i32
    %c0_i32_0 = arith.constant 0 : i32
    return %arg0, %c0_i32 : i32, i32
  }
}

</mosaic_0001>

<bundles_post_ra>
// kernel: tpu_custom_call.1
= control target key start
LH: loop header
LB: loop body
LE: loop exit
PB: predicated region body
PF: predicated region fallthrough
CT: control target
= control target key end

     0   :  { %12 = vsyncpa [#allocation3], 0  ;;  %s3361_s0 = inlined_call_operand.hbm [shape: bf16[16,896], index: 0, kind: input, shape index: {}]   ;;  %s3362_s1 = inlined_call_operand.hbm [shape: bf16[896,512], index: 1, kind: input, shape index: {}]   ;;  %s3363_s2 = inlined_call_operand.hbm [shape: f32[1,512], index: 2, kind: input, shape index: {}]   ;;  %s3364_s3 = inlined_call_operand.hbm [shape: bf16[512,128], index: 3, kind: input, shape index: {}]   ;;  %s3365_s4 = inlined_call_operand.vmem [shape: f32[1,128], index: 4, kind: input, shape index: {}]   ;;  %s3366_s5 = inlined_call_operand.hbm [shape: bf16[128,128], index: 5, kind: input, shape index: {}]   ;;  %s3367_s6 = inlined_call_operand.vmem [shape: f32[1,128], index: 6, kind: input, shape index: {}]   ;;  %s3368_s7 = inlined_call_operand.hbm [shape: f32[16,128], index: 7, kind: output, shape index: {}]  }
   0x1   :  { %13 = vsyncpa [#allocation6], 0 }
   0x2   :  { %14 = vsyncpa [#allocation9], 0 }
   0x3   :  { %15 = vsyncpa [#allocation4], 0  ;;  %s3244_s24 = smov [#allocation5]  }
   0x4   :  { %s33_s25 = sshll.u32 %s3244_s24, 4  ;;  %s34_s25 = int_to_ptr.vmem [resolvable:$true] %s33_s25 }
   0x5   :  { %s3124_s26 = scalar_lea.vmem %s34_s25, 28672  ;;  %p3129_p1 = scmp.lt.s32.totalorder %s34_s25, %s34_s25 }
   0x6   :  { %p3125_p0 = scmp.ne.s32.totalorder %s34_s25, %s3124_s26  ;;  %p3130_p2 = scmp.lt.s32.totalorder %s3124_s26, %s3124_s26 }
   0x8   :  { %p3131_p3 = por %p3130_p2, %p3129_p1 }
   0xa   :  { %p3132_p4 = pnand %p3131_p3, %p3125_p0 }
   0xc   :  { %3135 = shalt.err (!%p3132_p4)
}
   0xd   :  { %s3245_s27 = smov 256   ;;  %s3246_s28 = smov 16  }
   0xe   :  { %39 = dma.hbm_to_vmem [thread:$0]  %s3362_s1, 28672, %s34_s25, [#allocation6], %s3245_s27, %s3245_s27, %s3246_s28  }
   0xf   :  { %s3247_s8 = smov [#allocation8]  }
  0x10   :  { %s55_s9 = sshll.u32 %s3247_s8, 4  ;;  %s56_s9 = int_to_ptr.vmem [resolvable:$true] %s55_s9 }
  0x11   :  { %s3144_s10 = scalar_lea.vmem %s56_s9, 4096  ;;  %p3149_p6 = scmp.lt.s32.totalorder %s56_s9, %s56_s9 }
  0x12   :  { %p3145_p5 = scmp.ne.s32.totalorder %s56_s9, %s3144_s10  ;;  %p3150_p7 = scmp.lt.s32.totalorder %s3144_s10, %s3144_s10 }
  0x14   :  { %p3151_p8 = por %p3150_p7, %p3149_p6 }
  0x16   :  { %p3152_p9 = pnand %p3151_p8, %p3145_p5 }
  0x18   :  { %3155 = shalt.err (!%p3152_p9)
}
  0x19   :  { %s3248_s11 = smov 64   ;;  %s3249_s12 = smov 4  }
  0x1a   :  { %61 = dma.hbm_to_vmem [thread:$0]  %s3364_s3, 4096, %s56_s9, [#allocation9], %s3248_s11, %s3248_s11, %s3249_s12  }
  0x1b   :  { %s3250_s1 = smov [#allocation2]  }
  0x1c   :  { %s21_s15 = sshll.u32 %s3250_s1, 4  ;;  %s22_s15 = int_to_ptr.vmem [resolvable:$true] %s21_s15 }
  0x1d   :  { %s3164_s16 = scalar_lea.vmem %s22_s15, 896  ;;  %p3169_p11 = scmp.lt.s32.totalorder %s22_s15, %s22_s15 }
  0x1e   :  { %p3165_p10 = scmp.ne.s32.totalorder %s22_s15, %s3164_s16  ;;  %p3170_p12 = scmp.lt.s32.totalorder %s3164_s16, %s3164_s16 }
  0x20   :  { %p3171_p13 = por %p3170_p12, %p3169_p11 }
  0x22   :  { %p3172_p0 = pnand %p3171_p13, %p3165_p10 }
  0x24   :  { %3175 = shalt.err (!%p3172_p0)
}
  0x25   :  { %s3251_s17 = smov 448   ;;  %s3252_s18 = smov 28  }
  0x26   :  { %27 = dma.hbm_to_vmem [thread:$0]  %s3361_s0, 896, %s22_s15, [#allocation3], %s3251_s17, %s3251_s17, %s3252_s18  }
  0x27   :  { %s3253_s21 = smov [#allocation7]   ;;  %s3254_s3 = smov [#allocation10]  }
  0x28   :  { %s46_s22 = sshll.u32 %s3253_s21, 4  ;;  %s69_s23 = sshll.u32 %s3254_s3, 4  ;;  %s47_s22 = int_to_ptr.vmem [resolvable:$true] %s46_s22  ;;  %s70_s23 = int_to_ptr.vmem [resolvable:$true] %s69_s23 }
  0x29   :  { %s3184_s24 = scalar_lea.vmem %s47_s22, 64  ;;  %p3189_p2 = scmp.lt.s32.totalorder %s47_s22, %s47_s22 }
  0x2a   :  { %p3185_p1 = scmp.ne.s32.totalorder %s47_s22, %s3184_s24  ;;  %p3190_p3 = scmp.lt.s32.totalorder %s3184_s24, %s3184_s24 }
  0x2c   :  { %p3191_p4 = por %p3190_p3, %p3189_p2 }
  0x2e   :  { %p3192_p5 = pnand %p3191_p4, %p3185_p1 }
  0x30   :  { %3195 = shalt.err (!%p3192_p5)
}
  0x31   :  { %49 = dma.hbm_to_vmem [thread:$0]  %s3363_s2, 64, %s47_s22, [#allocation6]  }
  0x32   :  { %s3204_s27 = scalar_lea.vmem %s70_s23, 1024  ;;  %p3209_p7 = scmp.lt.s32.totalorder %s70_s23, %s70_s23 }
  0x33   :  { %p3205_p6 = scmp.ne.s32.totalorder %s70_s23, %s3204_s27  ;;  %p3210_p8 = scmp.lt.s32.totalorder %s3204_s27, %s3204_s27 }
  0x35   :  { %p3211_p9 = por %p3210_p8, %p3209_p7 }
  0x37   :  { %p3212_p10 = pnand %p3211_p9, %p3205_p6 }
  0x39   :  { %3215 = shalt.err (!%p3212_p10)
}
  0x3a   :  { %75 = dma.hbm_to_vmem [thread:$0]  %s3366_s5, 1024, %s70_s23, [#allocation9], %s3248_s11, %s3248_s11, %s3249_s12  }
  0x3b   :  { %3236 = dma.done.wait [#allocation3], 896  }
  0x3c   :  { %3237 = vsyncadd [#allocation3], 4294966400 }
  0x3d   :  { %3238 = dma.done.wait [#allocation6], 28736  }
  0x3e   :  { %3239 = vsyncadd [#allocation6], 4294938560 }
  0x3f   :  { %3240 = dma.done.wait [#allocation9], 5120  }
  0x40   :  { %3241 = vsyncadd [#allocation9], 4294962176  ;;  %v2722_v0 = vld [vmem:[#allocation5 + $0xe4] ss:$16 sps:$4 sm:$0xff]   ;;  %v2726_v2 = vld [vmem:[#allocation5 + $0xe0] ss:$16 sps:$4 sm:$0xff]  }
  0x41   :  { %v2724_v1 = vld [vmem:[#allocation5 + $0x2e4] ss:$16 sps:$4 sm:$0xff]   ;;  %1504 = vmatprep.subr.bf16.mxu0 %v2722_v0  ;;  %v2727_v3 = vld [vmem:[#allocation5 + $0x2e0] ss:$16 sps:$4 sm:$0xff]   ;;  %v3322_v49 = vld [vmem:[#allocation2 + $0x4] ss:$28 sps:$4 sm:$0xff]  }
  0x42   :  { %1547 = vmatprep.subr.bf16.mxu1 %v2724_v1  ;;  %v2728_v4 = vld [vmem:[#allocation5 + $0xc4] ss:$16 sps:$4 sm:$0xff]   ;;  %1505 = vmatpush1.bf16.msra.mxu0 %v2726_v2  ;;  %v2732_v6 = vld [vmem:[#allocation5 + $0xc0] ss:$16 sps:$4 sm:$0xff]   ;;  %vm3257_vm0 = vmmov 0  }
  0x43   :  { %1548 = vmatpush1.bf16.msra.mxu1 %v2727_v3  ;;  %v2730_v5 = vld [vmem:[#allocation5 + $0x2c4] ss:$16 sps:$4 sm:$0xff]   ;;  %1506 = vmatprep.subr.bf16.mxu0 %v2728_v4  ;;  %v2733_v7 = vld [vmem:[#allocation5 + $0x2c0] ss:$16 sps:$4 sm:$0xff]  }
  0x44   :  { %1549 = vmatprep.subr.bf16.mxu1 %v2730_v5  ;;  %v2734_v8 = vld [vmem:[#allocation5 + $0xa4] ss:$16 sps:$4 sm:$0xff]   ;;  %v2738_v10 = vld [vmem:[#allocation5 + $0xa0] ss:$16 sps:$4 sm:$0xff]   ;;  %1536 = vmatprep.mubr.bf16.mxu0 %v3322_v49 }
  0x45   :  { %v2736_v9 = vld [vmem:[#allocation5 + $0x2a4] ss:$16 sps:$4 sm:$0xff]   ;;  %v2739_v11 = vld [vmem:[#allocation5 + $0x2a0] ss:$16 sps:$4 sm:$0xff]  }
  0x46   :  { %1507 = vmatpush1.bf16.msra.mxu0 %v2732_v6  ;;  %v2740_v12 = vld [vmem:[#allocation5 + $0x84] ss:$16 sps:$4 sm:$0xff]   ;;  %v2744_v14 = vld [vmem:[#allocation5 + $0x80] ss:$16 sps:$4 sm:$0xff]  }
  0x47   :  { %1550 = vmatpush1.bf16.msra.mxu1 %v2733_v7  ;;  %1508 = vmatprep.subr.bf16.mxu0 %v2734_v8  ;;  %v2742_v13 = vld [vmem:[#allocation5 + $0x284] ss:$16 sps:$4 sm:$0xff]   ;;  %v2745_v15 = vld [vmem:[#allocation5 + $0x280] ss:$16 sps:$4 sm:$0xff]  }
  0x48   :  { %1551 = vmatprep.subr.bf16.mxu1 %v2736_v9  ;;  %v2746_v16 = vld [vmem:[#allocation5 + $0x64] ss:$16 sps:$4 sm:$0xff]   ;;  %v2750_v18 = vld [vmem:[#allocation5 + $0x60] ss:$16 sps:$4 sm:$0xff]  }
  0x49   :  { %v2748_v17 = vld [vmem:[#allocation5 + $0x264] ss:$16 sps:$4 sm:$0xff]   ;;  %v2751_v19 = vld [vmem:[#allocation5 + $0x260] ss:$16 sps:$4 sm:$0xff]  }
  0x4a   :  { %1509 = vmatpush1.bf16.msra.mxu0 %v2738_v10  ;;  %v2752_v20 = vld [vmem:[#allocation5 + $0x44] ss:$16 sps:$4 sm:$0xff]   ;;  %v2756_v22 = vld [vmem:[#allocation5 + $0x40] ss:$16 sps:$4 sm:$0xff]  }
  0x4b   :  { %1552 = vmatpush1.bf16.msra.mxu1 %v2739_v11  ;;  %1510 = vmatprep.subr.bf16.mxu0 %v2740_v12  ;;  %v2754_v21 = vld [vmem:[#allocation5 + $0x244] ss:$16 sps:$4 sm:$0xff]   ;;  %v2757_v23 = vld [vmem:[#allocation5 + $0x240] ss:$16 sps:$4 sm:$0xff]  }
  0x4c   :  { %1553 = vmatprep.subr.bf16.mxu1 %v2742_v13  ;;  %v2758_v24 = vld [vmem:[#allocation5 + $0x24] ss:$16 sps:$4 sm:$0xff]   ;;  %v2762_v26 = vld [vmem:[#allocation5 + $0x20] ss:$16 sps:$4 sm:$0xff]  }
  0x4d   :  { %v2760_v25 = vld [vmem:[#allocation5 + $0x224] ss:$16 sps:$4 sm:$0xff]   ;;  %v2763_v27 = vld [vmem:[#allocation5 + $0x220] ss:$16 sps:$4 sm:$0xff]  }
  0x4e   :  { %1511 = vmatpush1.bf16.msra.mxu0 %v2744_v14  ;;  %v2764_v28 = vld [vmem:[#allocation5 + $0x4] ss:$16 sps:$4 sm:$0xff]   ;;  %v2768_v30 = vld [vmem:[#allocation5] ss:$16 sps:$4 sm:$0xff]   ;;  %v3255_v14 = vmov 0  }
  0x4f   :  { %1554 = vmatpush1.bf16.msra.mxu1 %v2745_v15  ;;  %1512 = vmatprep.subr.bf16.mxu0 %v2746_v16  ;;  %v2766_v29 = vld [vmem:[#allocation5 + $0x204] ss:$16 sps:$4 sm:$0xff]   ;;  %v2769_v31 = vld [vmem:[#allocation5 + $0x200] ss:$16 sps:$4 sm:$0xff]  }
  0x50   :  { %1555 = vmatprep.subr.bf16.mxu1 %v2748_v17  ;;  %v2770_v32 = vld [vmem:[#allocation5 + $0x1e4] ss:$16 sps:$4 sm:$0xff]   ;;  %v2774_v34 = vld [vmem:[#allocation5 + $0x1e0] ss:$16 sps:$4 sm:$0xff]  }
  0x51   :  { %v2772_v33 = vld [vmem:[#allocation5 + $0x3e4] ss:$16 sps:$4 sm:$0xff]   ;;  %v2775_v35 = vld [vmem:[#allocation5 + $0x3e0] ss:$16 sps:$4 sm:$0xff]  }
  0x52   :  { %1513 = vmatpush1.bf16.msra.mxu0 %v2750_v18  ;;  %v2776_v36 = vld [vmem:[#allocation5 + $0x1c4] ss:$16 sps:$4 sm:$0xff]   ;;  %v2780_v38 = vld [vmem:[#allocation5 + $0x1c0] ss:$16 sps:$4 sm:$0xff]  }
  0x53   :  { %1556 = vmatpush1.bf16.msra.mxu1 %v2751_v19  ;;  %1514 = vmatprep.subr.bf16.mxu0 %v2752_v20  ;;  %v2778_v37 = vld [vmem:[#allocation5 + $0x3c4] ss:$16 sps:$4 sm:$0xff]   ;;  %v2781_v39 = vld [vmem:[#allocation5 + $0x3c0] ss:$16 sps:$4 sm:$0xff]  }
  0x54   :  { %1557 = vmatprep.subr.bf16.mxu1 %v2754_v21  ;;  %v2782_v40 = vld [vmem:[#allocation5 + $0x1a4] ss:$16 sps:$4 sm:$0xff]   ;;  %v2786_v42 = vld [vmem:[#allocation5 + $0x1a0] ss:$16 sps:$4 sm:$0xff]  }
  0x55   :  { %v2784_v41 = vld [vmem:[#allocation5 + $0x3a4] ss:$16 sps:$4 sm:$0xff]   ;;  %v2787_v43 = vld [vmem:[#allocation5 + $0x3a0] ss:$16 sps:$4 sm:$0xff]  }
  0x56   :  { %1515 = vmatpush1.bf16.msra.mxu0 %v2756_v22  ;;  %v2788_v44 = vld [vmem:[#allocation5 + $0x184] ss:$16 sps:$4 sm:$0xff]   ;;  %v2792_v46 = vld [vmem:[#allocation5 + $0x180] ss:$16 sps:$4 sm:$0xff]  }
  0x57   :  { %1558 = vmatpush1.bf16.msra.mxu1 %v2757_v23  ;;  %1516 = vmatprep.subr.bf16.mxu0 %v2758_v24  ;;  %v2790_v45 = vld [vmem:[#allocation5 + $0x384] ss:$16 sps:$4 sm:$0xff]   ;;  %v2793_v47 = vld [vmem:[#allocation5 + $0x380] ss:$16 sps:$4 sm:$0xff]  }
  0x58   :  { %1559 = vmatprep.subr.bf16.mxu1 %v2760_v25  ;;  %v2794_v48 = vld [vmem:[#allocation5 + $0x164] ss:$16 sps:$4 sm:$0xff]   ;;  %v2798_v52 = vld [vmem:[#allocation5 + $0x160] ss:$16 sps:$4 sm:$0xff]  }
  0x59   :  { %v2796_v50 = vld [vmem:[#allocation5 + $0x364] ss:$16 sps:$4 sm:$0xff]   ;;  %v2799_v53 = vld [vmem:[#allocation5 + $0x360] ss:$16 sps:$4 sm:$0xff]  }
  0x5a   :  { %1517 = vmatpush1.bf16.msra.mxu0 %v2762_v26  ;;  %v3324_v51 = vld [vmem:[#allocation2 + $0xc] ss:$28 sps:$4 sm:$0xff]   ;;  %v3328_v4 = vld [vmem:[#allocation2] ss:$28 sps:$4 sm:$0xff]  }
  0x5b   :  { %1560 = vmatpush1.bf16.msra.mxu1 %v2763_v27  ;;  %1518 = vmatprep.subr.bf16.mxu0 %v2764_v28  ;;  %v2800_v54 = vld [vmem:[#allocation5 + $0x144] ss:$16 sps:$4 sm:$0xff]   ;;  %v2804_v56 = vld [vmem:[#allocation5 + $0x140] ss:$16 sps:$4 sm:$0xff]  }
  0x5c   :  { %1561 = vmatprep.subr.bf16.mxu1 %v2766_v29  ;;  %1579 = vmatprep.mubr.bf16.mxu1 %v3324_v51  ;;  %v2802_v55 = vld [vmem:[#allocation5 + $0x344] ss:$16 sps:$4 sm:$0xff]   ;;  %v2805_v57 = vld [vmem:[#allocation5 + $0x340] ss:$16 sps:$4 sm:$0xff]  }
  0x5d   :  { %v2806_v58 = vld [vmem:[#allocation5 + $0x124] ss:$16 sps:$4 sm:$0xff]   ;;  %v2810_v60 = vld [vmem:[#allocation5 + $0x120] ss:$16 sps:$4 sm:$0xff]  }
  0x5e   :  { %1519 = vmatpush1.bf16.msra.mxu0 %v2768_v30  ;;  %v2808_v59 = vld [vmem:[#allocation5 + $0x324] ss:$16 sps:$4 sm:$0xff]   ;;  %v2811_v61 = vld [vmem:[#allocation5 + $0x320] ss:$16 sps:$4 sm:$0xff]  }
  0x5f   :  { %1562 = vmatpush1.bf16.msra.mxu1 %v2769_v31  ;;  %1520 = vmatprep.subr.bf16.mxu0 %v2770_v32  ;;  %v2812_v62 = vld [vmem:[#allocation5 + $0x104] ss:$16 sps:$4 sm:$0xff]   ;;  %v2816_v0 = vld [vmem:[#allocation5 + $0x100] ss:$16 sps:$4 sm:$0xff]  }
  0x60   :  { %1563 = vmatprep.subr.bf16.mxu1 %v2772_v33  ;;  %v2814_v63 = vld [vmem:[#allocation5 + $0x304] ss:$16 sps:$4 sm:$0xff]   ;;  %v2817_v1 = vld [vmem:[#allocation5 + $0x300] ss:$16 sps:$4 sm:$0xff]  }
  0x61   :  { %v2826_v2 = vld [vmem:[#allocation5 + $0x4e4] ss:$16 sps:$4 sm:$0xff]   ;;  %v3330_v5 = vld [vmem:[#allocation2 + $0x8] ss:$28 sps:$4 sm:$0xff]  }
  0x62   :  { %1521 = vmatpush2.bf16.msra.mxu0 %v2774_v34  ;;  %v2829_v3 = vld [vmem:[#allocation5 + $0x6e4] ss:$16 sps:$4 sm:$0xff]   ;;  %v2824_v6 = vld [vmem:[#allocation5 + $0x4e0] ss:$16 sps:$4 sm:$0xff]  }
  0x63   :  { %1564 = vmatpush2.bf16.msra.mxu1 %v2775_v35  ;;  %1522 = vmatprep.subr.bf16.mxu0 %v2776_v36  ;;  %v2827_v7 = vld [vmem:[#allocation5 + $0x6e0] ss:$16 sps:$4 sm:$0xff]   ;;  %v2832_v8 = vld [vmem:[#allocation5 + $0x4c4] ss:$16 sps:$4 sm:$0xff]   ;;  %v3335_v35 = vld [vmem:[#allocation2 + $0x14] ss:$28 sps:$4 sm:$0xff]  }
  0x64   :  { %1565 = vmatprep.subr.bf16.mxu1 %v2778_v37  ;;  %v2835_v9 = vld [vmem:[#allocation5 + $0x6c4] ss:$16 sps:$4 sm:$0xff]   ;;  %v2830_v10 = vld [vmem:[#allocation5 + $0x4c0] ss:$16 sps:$4 sm:$0xff]  }
  0x65   :  { %v2833_v11 = vld [vmem:[#allocation5 + $0x6c0] ss:$16 sps:$4 sm:$0xff]   ;;  %v2838_v12 = vld [vmem:[#allocation5 + $0x4a4] ss:$16 sps:$4 sm:$0xff]  }
  0x66   :  { %1523 = vmatpush2.bf16.msra.mxu0 %v2780_v38  ;;  %v2841_v13 = vld [vmem:[#allocation5 + $0x6a4] ss:$16 sps:$4 sm:$0xff]   ;;  %v2836_v15 = vld [vmem:[#allocation5 + $0x4a0] ss:$16 sps:$4 sm:$0xff]  }
  0x67   :  { %1566 = vmatpush2.bf16.msra.mxu1 %v2781_v39  ;;  %1524 = vmatprep.subr.bf16.mxu0 %v2782_v40  ;;  %v2839_v16 = vld [vmem:[#allocation5 + $0x6a0] ss:$16 sps:$4 sm:$0xff]   ;;  %v2844_v17 = vld [vmem:[#allocation5 + $0x484] ss:$16 sps:$4 sm:$0xff]   ;;  %v2878_v39 = vld [vmem:[#allocation5 + $0xec] ss:$16 sps:$4 sm:$0xff]  }
  0x68   :  { %1567 = vmatprep.subr.bf16.mxu1 %v2784_v41  ;;  %v2847_v18 = vld [vmem:[#allocation5 + $0x684] ss:$16 sps:$4 sm:$0xff]   ;;  %v2842_v19 = vld [vmem:[#allocation5 + $0x480] ss:$16 sps:$4 sm:$0xff]  }
  0x69   :  { %v2845_v20 = vld [vmem:[#allocation5 + $0x680] ss:$16 sps:$4 sm:$0xff]   ;;  %v2850_v21 = vld [vmem:[#allocation5 + $0x464] ss:$16 sps:$4 sm:$0xff]  }
  0x6a   :  { %1525 = vmatpush2.bf16.msra.mxu0 %v2786_v42  ;;  %v2853_v22 = vld [vmem:[#allocation5 + $0x664] ss:$16 sps:$4 sm:$0xff]   ;;  %v2848_v23 = vld [vmem:[#allocation5 + $0x460] ss:$16 sps:$4 sm:$0xff]   ;;  %v2876_v42 = vld [vmem:[#allocation5 + $0xe8] ss:$16 sps:$4 sm:$0xff]  }
  0x6b   :  { %1568 = vmatpush2.bf16.msra.mxu1 %v2787_v43  ;;  %1526 = vmatprep.subr.bf16.mxu0 %v2788_v44  ;;  %v2851_v24 = vld [vmem:[#allocation5 + $0x660] ss:$16 sps:$4 sm:$0xff]   ;;  %v2856_v25 = vld [vmem:[#allocation5 + $0x444] ss:$16 sps:$4 sm:$0xff]   ;;  %v2884_v44 = vld [vmem:[#allocation5 + $0xcc] ss:$16 sps:$4 sm:$0xff]  }
  0x6c   :  { %1569 = vmatprep.subr.bf16.mxu1 %v2790_v45  ;;  %v2859_v26 = vld [vmem:[#allocation5 + $0x644] ss:$16 sps:$4 sm:$0xff]   ;;  %v2854_v27 = vld [vmem:[#allocation5 + $0x440] ss:$16 sps:$4 sm:$0xff]  }
  0x6d   :  { %v2857_v28 = vld [vmem:[#allocation5 + $0x640] ss:$16 sps:$4 sm:$0xff]   ;;  %v2862_v29 = vld [vmem:[#allocation5 + $0x424] ss:$16 sps:$4 sm:$0xff]  }
  0x6e   :  { %1527 = vmatpush2.bf16.msra.mxu0 %v2792_v46  ;;  %v2865_v30 = vld [vmem:[#allocation5 + $0x624] ss:$16 sps:$4 sm:$0xff]   ;;  %v2860_v31 = vld [vmem:[#allocation5 + $0x420] ss:$16 sps:$4 sm:$0xff]   ;;  %v2882_v46 = vld [vmem:[#allocation5 + $0xc8] ss:$16 sps:$4 sm:$0xff]  }
  0x6f   :  { %1570 = vmatpush2.bf16.msra.mxu1 %v2793_v47  ;;  %1528 = vmatprep.subr.bf16.mxu0 %v2794_v48  ;;  %v2863_v32 = vld [vmem:[#allocation5 + $0x620] ss:$16 sps:$4 sm:$0xff]   ;;  %v2868_v33 = vld [vmem:[#allocation5 + $0x404] ss:$16 sps:$4 sm:$0xff]   ;;  %v2890_v48 = vld [vmem:[#allocation5 + $0xac] ss:$16 sps:$4 sm:$0xff]  }
  0x70   :  { %1571 = vmatprep.subr.bf16.mxu1 %v2796_v50  ;;  %v2871_v34 = vld [vmem:[#allocation5 + $0x604] ss:$16 sps:$4 sm:$0xff]   ;;  %v2866_v36 = vld [vmem:[#allocation5 + $0x400] ss:$16 sps:$4 sm:$0xff]  }
  0x71   :  { %v2869_v37 = vld [vmem:[#allocation5 + $0x600] ss:$16 sps:$4 sm:$0xff]   ;;  %v2874_v38 = vld [vmem:[#allocation5 + $0x5e4] ss:$16 sps:$4 sm:$0xff]  }
  0x72   :  { %1529 = vmatpush2.bf16.msra.mxu0 %v2798_v52  ;;  %v2872_v40 = vld [vmem:[#allocation5 + $0x5e0] ss:$16 sps:$4 sm:$0xff]   ;;  %v2881_v43 = vld [vmem:[#allocation5 + $0x5c4] ss:$16 sps:$4 sm:$0xff]   ;;  %v2888_v52 = vld [vmem:[#allocation5 + $0xa8] ss:$16 sps:$4 sm:$0xff]  }
  0x73   :  { %1572 = vmatpush2.bf16.msra.mxu1 %v2799_v53  ;;  %1530 = vmatprep.subr.bf16.mxu0 %v2800_v54  ;;  %v3338_v41 = vld [vmem:[#allocation2 + $0x18] ss:$28 sps:$4 sm:$0xff]   ;;  %v2887_v47 = vld [vmem:[#allocation5 + $0x5a4] ss:$16 sps:$4 sm:$0xff]  }
  0x74   :  { %1573 = vmatprep.subr.bf16.mxu1 %v2802_v55  ;;  %v2879_v45 = vld [vmem:[#allocation5 + $0x5c0] ss:$16 sps:$4 sm:$0xff]   ;;  %v2893_v53 = vld [vmem:[#allocation5 + $0x584] ss:$16 sps:$4 sm:$0xff]   ;;  %v2896_v54 = vld [vmem:[#allocation5 + $0x8c] ss:$16 sps:$4 sm:$0xff]  }
  0x75   :  { %v2885_v50 = vld [vmem:[#allocation5 + $0x5a0] ss:$16 sps:$4 sm:$0xff]  }
  0x76   :  { %1531 = vmatpush2.bf16.msra.mxu0 %v2804_v56  ;;  %v2891_v55 = vld [vmem:[#allocation5 + $0x580] ss:$16 sps:$4 sm:$0xff]   ;;  %v2894_v56 = vld [vmem:[#allocation5 + $0x88] ss:$16 sps:$4 sm:$0xff]  }
  0x77   :  { %1574 = vmatpush2.bf16.msra.mxu1 %v2805_v57  ;;  %1532 = vmatprep.subr.bf16.mxu0 %v2806_v58  ;;  %v2899_v57 = vld [vmem:[#allocation5 + $0x564] ss:$16 sps:$4 sm:$0xff]   ;;  %v2902_v58 = vld [vmem:[#allocation5 + $0x6c] ss:$16 sps:$4 sm:$0xff]  }
  0x78   :  { %1575 = vmatprep.subr.bf16.mxu1 %v2808_v59  ;;  %v2897_v59 = vld [vmem:[#allocation5 + $0x560] ss:$16 sps:$4 sm:$0xff]  }
  0x7a   :  { %1533 = vmatpush2.bf16.msra.mxu0 %v2810_v60  ;;  %v2905_v60 = vld [vmem:[#allocation5 + $0x544] ss:$16 sps:$4 sm:$0xff]  }
  0x7b   :  { %1576 = vmatpush2.bf16.msra.mxu1 %v2811_v61  ;;  %1534 = vmatprep.subr.bf16.mxu0 %v2812_v62  ;;  %v2908_v61 = vld [vmem:[#allocation5 + $0x4c] ss:$16 sps:$4 sm:$0xff]   ;;  %v2903_v62 = vld [vmem:[#allocation5 + $0x540] ss:$16 sps:$4 sm:$0xff]  }
  0x7c   :  { %1577 = vmatprep.subr.bf16.mxu1 %v2814_v63  ;;  %v2906_v63 = vld [vmem:[#allocation5 + $0x48] ss:$16 sps:$4 sm:$0xff]  }
  0x7e   :  { %1535 = vmatpush2.bf16.msra.mxu0 %v2816_v0  ;;  %v2911_v0 = vld [vmem:[#allocation5 + $0x524] ss:$16 sps:$4 sm:$0xff]  }
  0x7f   :  { %1578 = vmatpush2.bf16.msra.mxu1 %v2817_v1  ;;  %1590 = vmatprep.subr.bf16.mxu0 %v2826_v2  ;;  %v2914_v1 = vld [vmem:[#allocation5 + $0x2c] ss:$16 sps:$4 sm:$0xff]   ;;  %v2909_v2 = vld [vmem:[#allocation5 + $0x520] ss:$16 sps:$4 sm:$0xff]  }
  0x80   :  { %1633 = vmatprep.subr.bf16.mxu1 %v2829_v3  ;;  %v2912_v3 = vld [vmem:[#allocation5 + $0x28] ss:$16 sps:$4 sm:$0xff]  }
  0x81   :  { %1537 = vmatmul.mubr.bf16.vlgmr.msra.gmra.mxu0 %v3328_v4 }
  0x82   :  { %1580 = vmatmul.mubr.bf16.vlgmr.msra.gmra.mxu1 %v3330_v5  ;;  %1591 = vmatpush1.bf16.msra.mxu0 %v2824_v6  ;;  %v2917_v6 = vld [vmem:[#allocation5 + $0x504] ss:$16 sps:$4 sm:$0xff]  }
  0x83   :  { %1634 = vmatpush1.bf16.msra.mxu1 %v2827_v7  ;;  %1592 = vmatprep.subr.bf16.mxu0 %v2832_v8  ;;  %v2920_v7 = vld [vmem:[#allocation5 + $0xc] ss:$16 sps:$4 sm:$0xff]   ;;  %v2915_v8 = vld [vmem:[#allocation5 + $0x500] ss:$16 sps:$4 sm:$0xff]  }
  0x84   :  { %1635 = vmatprep.subr.bf16.mxu1 %v2835_v9  ;;  %1665 = vmatprep.mubr.bf16.mxu1 %v3255_v14  ;;  %v2918_v9 = vld [vmem:[#allocation5 + $0x8] ss:$16 sps:$4 sm:$0xff]  }
  0x85   :  { %1622 = vmatprep.mubr.bf16.mxu0 %v3335_v35 }
  0x86   :  { %1593 = vmatpush1.bf16.msra.mxu0 %v2830_v10  ;;  %v2926_v10 = vld [vmem:[#allocation5 + $0x1ec] ss:$16 sps:$4 sm:$0xff]  }
  0x87   :  { %1636 = vmatpush1.bf16.msra.mxu1 %v2833_v11  ;;  %1594 = vmatprep.subr.bf16.mxu0 %v2838_v12  ;;  %v2929_v11 = vld [vmem:[#allocation5 + $0x2ec] ss:$16 sps:$4 sm:$0xff]   ;;  %v3342_v12 = vld [vmem:[#allocation2 + $0x10] ss:$28 sps:$4 sm:$0xff]  }
  0x88   :  { %1637 = vmatprep.subr.bf16.mxu1 %v2841_v13  ;;  %v2924_v13 = vld [vmem:[#allocation5 + $0x1e8] ss:$16 sps:$4 sm:$0xff]  }
  0x8a   :  { %1595 = vmatpush1.bf16.msra.mxu0 %v2836_v15  ;;  %v2927_v15 = vld [vmem:[#allocation5 + $0x2e8] ss:$16 sps:$4 sm:$0xff]  }
  0x8b   :  { %1638 = vmatpush1.bf16.msra.mxu1 %v2839_v16  ;;  %1596 = vmatprep.subr.bf16.mxu0 %v2844_v17  ;;  %v2932_v16 = vld [vmem:[#allocation5 + $0x1cc] ss:$16 sps:$4 sm:$0xff]  }
  0x8c   :  { %1639 = vmatprep.subr.bf16.mxu1 %v2847_v18  ;;  %v2935_v17 = vld [vmem:[#allocation5 + $0x2cc] ss:$16 sps:$4 sm:$0xff]   ;;  %v2930_v18 = vld [vmem:[#allocation5 + $0x1c8] ss:$16 sps:$4 sm:$0xff]  }
  0x8e   :  { %1597 = vmatpush1.bf16.msra.mxu0 %v2842_v19  ;;  %v2933_v19 = vld [vmem:[#allocation5 + $0x2c8] ss:$16 sps:$4 sm:$0xff]  }
  0x8f   :  { %1640 = vmatpush1.bf16.msra.mxu1 %v2845_v20  ;;  %1598 = vmatprep.subr.bf16.mxu0 %v2850_v21  ;;  %v2938_v20 = vld [vmem:[#allocation5 + $0x1ac] ss:$16 sps:$4 sm:$0xff]  }
  0x90   :  { %1641 = vmatprep.subr.bf16.mxu1 %v2853_v22  ;;  %v2941_v21 = vld [vmem:[#allocation5 + $0x2ac] ss:$16 sps:$4 sm:$0xff]   ;;  %v2936_v22 = vld [vmem:[#allocation5 + $0x1a8] ss:$16 sps:$4 sm:$0xff]  }
  0x92   :  { %1599 = vmatpush1.bf16.msra.mxu0 %v2848_v23  ;;  %v2939_v23 = vld [vmem:[#allocation5 + $0x2a8] ss:$16 sps:$4 sm:$0xff]  }
  0x93   :  { %1642 = vmatpush1.bf16.msra.mxu1 %v2851_v24  ;;  %1600 = vmatprep.subr.bf16.mxu0 %v2856_v25  ;;  %v2944_v24 = vld [vmem:[#allocation5 + $0x18c] ss:$16 sps:$4 sm:$0xff]  }
  0x94   :  { %1643 = vmatprep.subr.bf16.mxu1 %v2859_v26  ;;  %v2947_v25 = vld [vmem:[#allocation5 + $0x28c] ss:$16 sps:$4 sm:$0xff]   ;;  %v2942_v26 = vld [vmem:[#allocation5 + $0x188] ss:$16 sps:$4 sm:$0xff]  }
  0x96   :  { %1601 = vmatpush1.bf16.msra.mxu0 %v2854_v27  ;;  %v2945_v27 = vld [vmem:[#allocation5 + $0x288] ss:$16 sps:$4 sm:$0xff]  }
  0x97   :  { %1644 = vmatpush1.bf16.msra.mxu1 %v2857_v28  ;;  %1602 = vmatprep.subr.bf16.mxu0 %v2862_v29  ;;  %v2950_v28 = vld [vmem:[#allocation5 + $0x16c] ss:$16 sps:$4 sm:$0xff]  }
  0x98   :  { %1645 = vmatprep.subr.bf16.mxu1 %v2865_v30  ;;  %v2953_v29 = vld [vmem:[#allocation5 + $0x26c] ss:$16 sps:$4 sm:$0xff]   ;;  %v2948_v30 = vld [vmem:[#allocation5 + $0x168] ss:$16 sps:$4 sm:$0xff]  }
  0x9a   :  { %1603 = vmatpush1.bf16.msra.mxu0 %v2860_v31  ;;  %v2956_v31 = vld [vmem:[#allocation5 + $0x14c] ss:$16 sps:$4 sm:$0xff]  }
  0x9b   :  { %1646 = vmatpush1.bf16.msra.mxu1 %v2863_v32  ;;  %1604 = vmatprep.subr.bf16.mxu0 %v2868_v33  ;;  %v2959_v32 = vld [vmem:[#allocation5 + $0x24c] ss:$16 sps:$4 sm:$0xff]   ;;  %v2954_v33 = vld [vmem:[#allocation5 + $0x148] ss:$16 sps:$4 sm:$0xff]  }
  0x9c   :  { %1647 = vmatprep.subr.bf16.mxu1 %v2871_v34  ;;  %v2957_v34 = vld [vmem:[#allocation5 + $0x248] ss:$16 sps:$4 sm:$0xff]  }
  0x9e   :  { %1605 = vmatpush1.bf16.msra.mxu0 %v2866_v36  ;;  %v2962_v36 = vld [vmem:[#allocation5 + $0x12c] ss:$16 sps:$4 sm:$0xff]  }
  0x9f   :  { %1648 = vmatpush1.bf16.msra.mxu1 %v2869_v37  ;;  %1606 = vmatprep.subr.bf16.mxu0 %v2874_v38  ;;  %v2965_v37 = vld [vmem:[#allocation5 + $0x22c] ss:$16 sps:$4 sm:$0xff]   ;;  %v2960_v38 = vld [vmem:[#allocation5 + $0x128] ss:$16 sps:$4 sm:$0xff]  }
  0xa0   :  { %1676 = vmatprep.subr.bf16.mxu1 %v2878_v39  ;;  %v2963_v39 = vld [vmem:[#allocation5 + $0x228] ss:$16 sps:$4 sm:$0xff]  }
  0xa2   :  { %1666 = vmatmul.mubr.bf16.vlgmr.msra.gmra.mxu1 %v3338_v41  ;;  %1607 = vmatpush2.bf16.msra.mxu0 %v2872_v40  ;;  %v2968_v40 = vld [vmem:[#allocation5 + $0x10c] ss:$16 sps:$4 sm:$0xff]  }
  0xa3   :  { %1677 = vmatpush1.bf16.msra.mxu1 %v2876_v42  ;;  %1608 = vmatprep.subr.bf16.mxu0 %v2881_v43  ;;  %v2971_v42 = vld [vmem:[#allocation5 + $0x20c] ss:$16 sps:$4 sm:$0xff]   ;;  %v2966_v43 = vld [vmem:[#allocation5 + $0x108] ss:$16 sps:$4 sm:$0xff]  }
  0xa4   :  { %1678 = vmatprep.subr.bf16.mxu1 %v2884_v44  ;;  %1708 = vmatprep.mubr.bf16.mxu1 %v3322_v49  ;;  %v2900_v49 = vld [vmem:[#allocation5 + $0x68] ss:$16 sps:$4 sm:$0xff]  }
  0xa5   :  { %v2969_v44 = vld [vmem:[#allocation5 + $0x208] ss:$16 sps:$4 sm:$0xff]  }
  0xa6   :  { %1609 = vmatpush2.bf16.msra.mxu0 %v2879_v45  ;;  %v2974_v45 = vld [vmem:[#allocation5 + $0x3ec] ss:$16 sps:$4 sm:$0xff]  }
  0xa7   :  { %1679 = vmatpush1.bf16.msra.mxu1 %v2882_v46  ;;  %1610 = vmatprep.subr.bf16.mxu0 %v2887_v47  ;;  %v2977_v46 = vld [vmem:[#allocation5 + $0x4ec] ss:$16 sps:$4 sm:$0xff]   ;;  %v2972_v47 = vld [vmem:[#allocation5 + $0x3e8] ss:$16 sps:$4 sm:$0xff]  }
  0xa8   :  { %1680 = vmatprep.subr.bf16.mxu1 %v2890_v48  ;;  %v2975_v48 = vld [vmem:[#allocation5 + $0x4e8] ss:$16 sps:$4 sm:$0xff]  }
  0xaa   :  { %1611 = vmatpush2.bf16.msra.mxu0 %v2885_v50  ;;  %v2980_v50 = vld [vmem:[#allocation5 + $0x3cc] ss:$16 sps:$4 sm:$0xff]  }
  0xab   :  { %1681 = vmatpush1.bf16.msra.mxu1 %v2888_v52  ;;  %1612 = vmatprep.subr.bf16.mxu0 %v2893_v53  ;;  %v2983_v52 = vld [vmem:[#allocation5 + $0x4cc] ss:$16 sps:$4 sm:$0xff]   ;;  %v2978_v53 = vld [vmem:[#allocation5 + $0x3c8] ss:$16 sps:$4 sm:$0xff]  }
  0xac   :  { %1682 = vmatprep.subr.bf16.mxu1 %v2896_v54  ;;  %v2981_v54 = vld [vmem:[#allocation5 + $0x4c8] ss:$16 sps:$4 sm:$0xff]  }
  0xae   :  { %1613 = vmatpush2.bf16.msra.mxu0 %v2891_v55  ;;  %v2986_v55 = vld [vmem:[#allocation5 + $0x3ac] ss:$16 sps:$4 sm:$0xff]  }
  0xaf   :  { %1683 = vmatpush1.bf16.msra.mxu1 %v2894_v56  ;;  %1614 = vmatprep.subr.bf16.mxu0 %v2899_v57  ;;  %v2989_v56 = vld [vmem:[#allocation5 + $0x4ac] ss:$16 sps:$4 sm:$0xff]   ;;  %v2984_v57 = vld [vmem:[#allocation5 + $0x3a8] ss:$16 sps:$4 sm:$0xff]  }
  0xb0   :  { %1684 = vmatprep.subr.bf16.mxu1 %v2902_v58  ;;  %v2987_v58 = vld [vmem:[#allocation5 + $0x4a8] ss:$16 sps:$4 sm:$0xff]  }
  0xb2   :  { %1615 = vmatpush2.bf16.msra.mxu0 %v2897_v59  ;;  %v2992_v59 = vld [vmem:[#allocation5 + $0x38c] ss:$16 sps:$4 sm:$0xff]  }
  0xb3   :  { %1685 = vmatpush1.bf16.msra.mxu1 %v2900_v49  ;;  %1616 = vmatprep.subr.bf16.mxu0 %v2905_v60  ;;  %v2995_v49 = vld [vmem:[#allocation5 + $0x48c] ss:$16 sps:$4 sm:$0xff]   ;;  %v2990_v60 = vld [vmem:[#allocation5 + $0x388] ss:$16 sps:$4 sm:$0xff]  }
  0xb4   :  { %1686 = vmatprep.subr.bf16.mxu1 %v2908_v61  ;;  %v2993_v61 = vld [vmem:[#allocation5 + $0x488] ss:$16 sps:$4 sm:$0xff]  }
  0xb6   :  { %1617 = vmatpush2.bf16.msra.mxu0 %v2903_v62  ;;  %v2998_v62 = vld [vmem:[#allocation5 + $0x36c] ss:$16 sps:$4 sm:$0xff]  }
  0xb7   :  { %1687 = vmatpush1.bf16.msra.mxu1 %v2906_v63  ;;  %1618 = vmatprep.subr.bf16.mxu0 %v2911_v0  ;;  %v2996_v63 = vld [vmem:[#allocation5 + $0x368] ss:$16 sps:$4 sm:$0xff]  }
  0xb8   :  { %1688 = vmatprep.subr.bf16.mxu1 %v2914_v1  ;;  %v2999_v0 = vld [vmem:[#allocation5 + $0x468] ss:$16 sps:$4 sm:$0xff]   ;;  %v3004_v1 = vld [vmem:[#allocation5 + $0x34c] ss:$16 sps:$4 sm:$0xff]  }
  0xba   :  { %1619 = vmatpush2.bf16.msra.mxu0 %v2909_v2  ;;  %v3007_v2 = vld [vmem:[#allocation5 + $0x44c] ss:$16 sps:$4 sm:$0xff]  }
  0xbb   :  { %1689 = vmatpush1.bf16.msra.mxu1 %v2912_v3  ;;  %1620 = vmatprep.subr.bf16.mxu0 %v2917_v6  ;;  %v3005_v3 = vld [vmem:[#allocation5 + $0x448] ss:$16 sps:$4 sm:$0xff]   ;;  %v3010_v6 = vld [vmem:[#allocation5 + $0x32c] ss:$16 sps:$4 sm:$0xff]  }
  0xbc   :  { %1690 = vmatprep.subr.bf16.mxu1 %v2920_v7  ;;  %v3013_v7 = vld [vmem:[#allocation5 + $0x42c] ss:$16 sps:$4 sm:$0xff]  }
  0xbe   :  { %1621 = vmatpush2.bf16.msra.mxu0 %v2915_v8  ;;  %v3008_v8 = vld [vmem:[#allocation5 + $0x328] ss:$16 sps:$4 sm:$0xff]  }
  0xbf   :  { %1691 = vmatpush1.bf16.msra.mxu1 %v2918_v9  ;;  %1719 = vmatprep.subr.bf16.mxu0 %v2929_v11  ;;  %v3011_v9 = vld [vmem:[#allocation5 + $0x428] ss:$16 sps:$4 sm:$0xff]   ;;  %v3019_v11 = vld [vmem:[#allocation5 + $0x40c] ss:$16 sps:$4 sm:$0xff]  }
  0xc0   :  { %1692 = vmatprep.subr.bf16.mxu1 %v2926_v10  ;;  %v3016_v10 = vld [vmem:[#allocation5 + $0x30c] ss:$16 sps:$4 sm:$0xff]  }
  0xc1   :  { %1623 = vmatmul.mubr.bf16.vlgmr.msra.gmra.mxu0 %v3342_v12 }
  0xc2   :  { %1720 = vmatpush1.bf16.msra.mxu0 %v2927_v15  ;;  %1751 = vmatprep.mubr.bf16.mxu0 %v3324_v51  ;;  %v2951_v51 = vld [vmem:[#allocation5 + $0x268] ss:$16 sps:$4 sm:$0xff]  }
  0xc3   :  { %1693 = vmatpush2.bf16.msra.mxu1 %v2924_v13  ;;  %1721 = vmatprep.subr.bf16.mxu0 %v2935_v17  ;;  %v3014_v13 = vld [vmem:[#allocation5 + $0x308] ss:$16 sps:$4 sm:$0xff]   ;;  %v3025_v17 = vld [vmem:[#allocation5 + $0x6ec] ss:$16 sps:$4 sm:$0xff]  }
  0xc4   :  { %1694 = vmatprep.subr.bf16.mxu1 %v2932_v16  ;;  %v3017_v15 = vld [vmem:[#allocation5 + $0x408] ss:$16 sps:$4 sm:$0xff]   ;;  %v3022_v16 = vld [vmem:[#allocation5 + $0x5ec] ss:$16 sps:$4 sm:$0xff]  }
  0xc6   :  { %1722 = vmatpush1.bf16.msra.mxu0 %v2933_v19  ;;  %v3023_v19 = vld [vmem:[#allocation5 + $0x6e8] ss:$16 sps:$4 sm:$0xff]  }
  0xc7   :  { %1695 = vmatpush2.bf16.msra.mxu1 %v2930_v18  ;;  %1723 = vmatprep.subr.bf16.mxu0 %v2941_v21  ;;  %v3020_v18 = vld [vmem:[#allocation5 + $0x5e8] ss:$16 sps:$4 sm:$0xff]   ;;  %v3031_v21 = vld [vmem:[#allocation5 + $0x6cc] ss:$16 sps:$4 sm:$0xff]  }
  0xc8   :  { %1696 = vmatprep.subr.bf16.mxu1 %v2938_v20  ;;  %v3028_v20 = vld [vmem:[#allocation5 + $0x5cc] ss:$16 sps:$4 sm:$0xff]  }
  0xca   :  { %1724 = vmatpush1.bf16.msra.mxu0 %v2939_v23  ;;  %v3029_v23 = vld [vmem:[#allocation5 + $0x6c8] ss:$16 sps:$4 sm:$0xff]  }
  0xcb   :  { %1697 = vmatpush2.bf16.msra.mxu1 %v2936_v22  ;;  %1725 = vmatprep.subr.bf16.mxu0 %v2947_v25  ;;  %v3026_v22 = vld [vmem:[#allocation5 + $0x5c8] ss:$16 sps:$4 sm:$0xff]   ;;  %v3037_v25 = vld [vmem:[#allocation5 + $0x6ac] ss:$16 sps:$4 sm:$0xff]  }
  0xcc   :  { %1698 = vmatprep.subr.bf16.mxu1 %v2944_v24  ;;  %v3034_v24 = vld [vmem:[#allocation5 + $0x5ac] ss:$16 sps:$4 sm:$0xff]  }
  0xce   :  { %1726 = vmatpush1.bf16.msra.mxu0 %v2945_v27  ;;  %v3035_v27 = vld [vmem:[#allocation5 + $0x6a8] ss:$16 sps:$4 sm:$0xff]  }
  0xcf   :  { %1699 = vmatpush2.bf16.msra.mxu1 %v2942_v26  ;;  %1727 = vmatprep.subr.bf16.mxu0 %v2953_v29  ;;  %v3032_v26 = vld [vmem:[#allocation5 + $0x5a8] ss:$16 sps:$4 sm:$0xff]   ;;  %v3043_v29 = vld [vmem:[#allocation5 + $0x68c] ss:$16 sps:$4 sm:$0xff]  }
  0xd0   :  { %1700 = vmatprep.subr.bf16.mxu1 %v2950_v28  ;;  %v3040_v28 = vld [vmem:[#allocation5 + $0x58c] ss:$16 sps:$4 sm:$0xff]  }
  0xd2   :  { %1728 = vmatpush1.bf16.msra.mxu0 %v2951_v51  ;;  %v3046_v51 = vld [vmem:[#allocation5 + $0x56c] ss:$16 sps:$4 sm:$0xff]  }
  0xd3   :  { %1701 = vmatpush2.bf16.msra.mxu1 %v2948_v30  ;;  %1729 = vmatprep.subr.bf16.mxu0 %v2959_v32  ;;  %v3041_v30 = vld [vmem:[#allocation5 + $0x688] ss:$16 sps:$4 sm:$0xff]  }
  0xd4   :  { %1702 = vmatprep.subr.bf16.mxu1 %v2956_v31  ;;  %v3049_v31 = vld [vmem:[#allocation5 + $0x66c] ss:$16 sps:$4 sm:$0xff]   ;;  %v3044_v32 = vld [vmem:[#allocation5 + $0x568] ss:$16 sps:$4 sm:$0xff]  }
  0xd6   :  { %1730 = vmatpush1.bf16.msra.mxu0 %v2957_v34  ;;  %v3055_v34 = vld [vmem:[#allocation5 + $0x64c] ss:$16 sps:$4 sm:$0xff]  }
  0xd7   :  { %1703 = vmatpush2.bf16.msra.mxu1 %v2954_v33  ;;  %1731 = vmatprep.subr.bf16.mxu0 %v2965_v37  ;;  %v3052_v33 = vld [vmem:[#allocation5 + $0x54c] ss:$16 sps:$4 sm:$0xff]   ;;  %v3053_v37 = vld [vmem:[#allocation5 + $0x648] ss:$16 sps:$4 sm:$0xff]  }
  0xd8   :  { %1704 = vmatprep.subr.bf16.mxu1 %v2962_v36  ;;  %v3050_v36 = vld [vmem:[#allocation5 + $0x548] ss:$16 sps:$4 sm:$0xff]  }
  0xda   :  { %1732 = vmatpush1.bf16.msra.mxu0 %v2963_v39  ;;  %v3061_v39 = vld [vmem:[#allocation5 + $0x62c] ss:$16 sps:$4 sm:$0xff]  }
  0xdb   :  { %1705 = vmatpush2.bf16.msra.mxu1 %v2960_v38  ;;  %1733 = vmatprep.subr.bf16.mxu0 %v2971_v42  ;;  %v3058_v38 = vld [vmem:[#allocation5 + $0x52c] ss:$16 sps:$4 sm:$0xff]   ;;  %v3059_v42 = vld [vmem:[#allocation5 + $0x628] ss:$16 sps:$4 sm:$0xff]  }
  0xdc   :  { %1706 = vmatprep.subr.bf16.mxu1 %v2968_v40  ;;  %v3056_v40 = vld [vmem:[#allocation5 + $0x528] ss:$16 sps:$4 sm:$0xff]  }
  0xde   :  { %1734 = vmatpush1.bf16.msra.mxu0 %v2969_v44  ;;  %v3067_v44 = vld [vmem:[#allocation5 + $0x60c] ss:$16 sps:$4 sm:$0xff]  }
  0xdf   :  { %1707 = vmatpush2.bf16.msra.mxu1 %v2966_v43  ;;  %1735 = vmatprep.subr.bf16.mxu0 %v2974_v45  ;;  %v3064_v43 = vld [vmem:[#allocation5 + $0x50c] ss:$16 sps:$4 sm:$0xff]   ;;  %v3062_v45 = vld [vmem:[#allocation5 + $0x508] ss:$16 sps:$4 sm:$0xff]  }
  0xe0   :  { %1762 = vmatprep.subr.bf16.mxu1 %v2977_v46  ;;  %v3065_v46 = vld [vmem:[#allocation5 + $0x608] ss:$16 sps:$4 sm:$0xff]  }
  0xe2   :  { %1709 = vmatmul.mubr.bf16.vlgmr.msra.gmra.mxu1 %v3328_v4  ;;  %1736 = vmatpush2.bf16.msra.mxu0 %v2972_v47  ;;  %v3001_v4 = vld [vmem:[#allocation5 + $0x46c] ss:$16 sps:$4 sm:$0xff]  }
  0xe3   :  { %1763 = vmatpush1.bf16.msra.mxu1 %v2975_v48  ;;  %1737 = vmatprep.subr.bf16.mxu0 %v2980_v50  ;;  %v3068_v47 = vld [vmem:[#allocation8 + $0x78] sm:$0xff]   ;;  %v3070_v50 = vld [vmem:[#allocation8 + $0x70] sm:$0xff]  }
  0xe4   :  { %1764 = vmatprep.subr.bf16.mxu1 %v2983_v52  ;;  %1794 = vmatprep.mubr.bf16.mxu1 %v3335_v35  ;;  %v3002_v35 = vld [vmem:[#allocation5 + $0x348] ss:$16 sps:$4 sm:$0xff]   ;;  %v3069_v48 = vld [vmem:[#allocation8 + $0x38] sm:$0xff]  }
  0xe5   :  { %v3071_v52 = vld [vmem:[#allocation8 + $0x30] sm:$0xff]  }
  0xe6   :  { %1738 = vmatpush2.bf16.msra.mxu0 %v2978_v53  ;;  %v3072_v53 = vld [vmem:[#allocation8 + $0x68] sm:$0xff]  }
  0xe7   :  { %1765 = vmatpush1.bf16.msra.mxu1 %v2981_v54  ;;  %1739 = vmatprep.subr.bf16.mxu0 %v2986_v55  ;;  %v3073_v54 = vld [vmem:[#allocation8 + $0x28] sm:$0xff]   ;;  %v3074_v55 = vld [vmem:[#allocation8 + $0x60] sm:$0xff]  }
  0xe8   :  { %1766 = vmatprep.subr.bf16.mxu1 %v2989_v56  ;;  %v3075_v56 = vld [vmem:[#allocation8 + $0x20] sm:$0xff]  }
  0xea   :  { %1740 = vmatpush2.bf16.msra.mxu0 %v2984_v57  ;;  %v3076_v57 = vld [vmem:[#allocation8 + $0x58] sm:$0xff]  }
  0xeb   :  { %1767 = vmatpush1.bf16.msra.mxu1 %v2987_v58  ;;  %1741 = vmatprep.subr.bf16.mxu0 %v2992_v59  ;;  %v3077_v58 = vld [vmem:[#allocation8 + $0x18] sm:$0xff]   ;;  %v3078_v59 = vld [vmem:[#allocation8 + $0x50] sm:$0xff]  }
  0xec   :  { %1768 = vmatprep.subr.bf16.mxu1 %v2995_v49  ;;  %v3081_v49 = vld [vmem:[#allocation8 + $0x8] sm:$0xff]  }
  0xee   :  { %1742 = vmatpush2.bf16.msra.mxu0 %v2990_v60  ;;  %v3082_v60 = vld [vmem:[#allocation8 + $0x40] sm:$0xff]  }
  0xef   :  { %1769 = vmatpush1.bf16.msra.mxu1 %v2993_v61  ;;  %1743 = vmatprep.subr.bf16.mxu0 %v2998_v62  ;;  %v3083_v61 = vld [vmem:[#allocation8] sm:$0xff]   ;;  %v3084_v62 = vld [vmem:[#allocation8 + $0xf8] sm:$0xff]  }
  0xf0   :  { %1770 = vmatprep.subr.bf16.mxu1 %v3001_v4  ;;  %v3085_v4 = vld [vmem:[#allocation8 + $0xb8] sm:$0xff]  }
  0xf2   :  { %1744 = vmatpush2.bf16.msra.mxu0 %v2996_v63  ;;  %v3086_v63 = vld [vmem:[#allocation8 + $0xf0] sm:$0xff]  }
  0xf3   :  { %1771 = vmatpush1.bf16.msra.mxu1 %v2999_v0  ;;  %1745 = vmatprep.subr.bf16.mxu0 %v3004_v1  ;;  %v3087_v0 = vld [vmem:[#allocation8 + $0xb0] sm:$0xff]   ;;  %v3088_v1 = vld [vmem:[#allocation8 + $0xe8] sm:$0xff]  }
  0xf4   :  { %1772 = vmatprep.subr.bf16.mxu1 %v3007_v2  ;;  %v3089_v2 = vld [vmem:[#allocation8 + $0xa8] sm:$0xff]  }
  0xf6   :  { %1746 = vmatpush2.bf16.msra.mxu0 %v3002_v35  ;;  %v3090_v35 = vld [vmem:[#allocation8 + $0xe0] sm:$0xff]  }
  0xf7   :  { %1773 = vmatpush1.bf16.msra.mxu1 %v3005_v3  ;;  %1747 = vmatprep.subr.bf16.mxu0 %v3010_v6  ;;  %v3091_v3 = vld [vmem:[#allocation8 + $0xa0] sm:$0xff]   ;;  %v3092_v6 = vld [vmem:[#allocation8 + $0xd8] sm:$0xff]  }
  0xf8   :  { %1774 = vmatprep.subr.bf16.mxu1 %v3013_v7  ;;  %v3093_v7 = vld [vmem:[#allocation8 + $0x98] sm:$0xff]  }
  0xfa   :  { %1748 = vmatpush2.bf16.msra.mxu0 %v3008_v8  ;;  %v3094_v8 = vld [vmem:[#allocation8 + $0xd0] sm:$0xff]  }
  0xfb   :  { %1775 = vmatpush1.bf16.msra.mxu1 %v3011_v9  ;;  %1749 = vmatprep.subr.bf16.mxu0 %v3016_v10  ;;  %v3095_v9 = vld [vmem:[#allocation8 + $0x90] sm:$0xff]   ;;  %v3096_v10 = vld [vmem:[#allocation8 + $0xc8] sm:$0xff]  }
  0xfc   :  { %1776 = vmatprep.subr.bf16.mxu1 %v3019_v11  ;;  %v3097_v11 = vld [vmem:[#allocation8 + $0x88] sm:$0xff]  }
  0xfe   :  { %1750 = vmatpush2.bf16.msra.mxu0 %v3014_v13  ;;  %v3098_v13 = vld [vmem:[#allocation8 + $0xc0] sm:$0xff]  }
  0xff   :  { %1777 = vmatpush1.bf16.msra.mxu1 %v3017_v15  ;;  %1805 = vmatprep.subr.bf16.mxu0 %v3025_v17  ;;  %v3099_v15 = vld [vmem:[#allocation8 + $0x80] sm:$0xff]  }
 0x100   :  { %1778 = vmatprep.subr.bf16.mxu1 %v3022_v16  ;;  %v328_v16 = vlaneseq }
 0x101   :  { %1752 = vmatmul.mubr.bf16.vlgmr.msra.gmra.mxu0 %v3330_v5  ;;  %v3038_v5 = vld [vmem:[#allocation5 + $0x588] ss:$16 sps:$4 sm:$0xff]  }
 0x102   :  { %1806 = vmatpush1.bf16.msra.mxu0 %v3023_v19  ;;  %1837 = vmatprep.mubr.bf16.mxu0 %v3255_v14  ;;  %v3047_v14 = vld [vmem:[#allocation5 + $0x668] ss:$16 sps:$4 sm:$0xff]  }
 0x103   :  { %1779 = vmatpush2.bf16.msra.mxu1 %v3020_v18  ;;  %1807 = vmatprep.subr.bf16.mxu0 %v3031_v21  ;;  %v329_v18 = vshrl.u32 %v328_v16, 7 }
 0x104   :  { %1780 = vmatprep.subr.bf16.mxu1 %v3028_v20 }
 0x105   :  { %v334_v21 = vsub.s32 1, %v329_v18 }
 0x106   :  { %1808 = vmatpush1.bf16.msra.mxu0 %v3029_v23 }
 0x107   :  { %1781 = vmatpush2.bf16.msra.mxu1 %v3026_v22  ;;  %1809 = vmatprep.subr.bf16.mxu0 %v3037_v25  ;;  %v330_v22 = vsub.s32 0, %v329_v18  ;;  %v326_v25 = vld [vmem:[#allocation7] sm:$0xf] }
 0x108   :  { %1782 = vmatprep.subr.bf16.mxu1 %v3034_v24 }
 0x10a   :  { %1810 = vmatpush1.bf16.msra.mxu0 %v3035_v27  ;;  %v331_v27 = vrot.slane %v326_v25, %v330_v22 }
 0x10b   :  { %1783 = vmatpush2.bf16.msra.mxu1 %v3032_v26  ;;  %1811 = vmatprep.subr.bf16.mxu0 %v3043_v29  ;;  %v335_v26 = vrot.slane %v326_v25, %v334_v21 }
 0x10c   :  { %1784 = vmatprep.subr.bf16.mxu1 %v3040_v28 }
 0x10e   :  { %1812 = vmatpush1.bf16.msra.mxu0 %v3041_v30 }
 0x10f   :  { %1785 = vmatpush2.bf16.msra.mxu1 %v3038_v5  ;;  %1813 = vmatprep.subr.bf16.mxu0 %v3049_v31 }
 0x110   :  { %1786 = vmatprep.subr.bf16.mxu1 %v3046_v51 }
 0x112   :  { %1814 = vmatpush1.bf16.msra.mxu0 %v3047_v14 }
 0x113   :  { %1787 = vmatpush2.bf16.msra.mxu1 %v3044_v32  ;;  %1815 = vmatprep.subr.bf16.mxu0 %v3055_v34 }
 0x114   :  { %1788 = vmatprep.subr.bf16.mxu1 %v3052_v33 }
 0x116   :  { %1816 = vmatpush1.bf16.msra.mxu0 %v3053_v37 }
 0x117   :  { %1789 = vmatpush2.bf16.msra.mxu1 %v3050_v36  ;;  %1817 = vmatprep.subr.bf16.mxu0 %v3061_v39 }
 0x118   :  { %1790 = vmatprep.subr.bf16.mxu1 %v3058_v38 }
 0x11a   :  { %1818 = vmatpush1.bf16.msra.mxu0 %v3059_v42 }
 0x11b   :  { %1791 = vmatpush2.bf16.msra.mxu1 %v3056_v40  ;;  %1819 = vmatprep.subr.bf16.mxu0 %v3067_v44 }
 0x11c   :  { %1792 = vmatprep.subr.bf16.mxu1 %v3064_v43 }
 0x11e   :  { %1820 = vmatpush1.bf16.msra.mxu0 %v3065_v46 }
 0x11f   :  { %1793 = vmatpush2.bf16.msra.mxu1 %v3062_v45  ;;  %2632 = vmatprep.subr.bf16.mxu0 %v3068_v47 }
 0x120   :  { %2654 = vmatprep.subr.bf16.mxu1 %v3084_v62 }
 0x121   :  { %1838 = vmatmul.mubr.bf16.vlgmr.msra.gmra.mxu0 %v3338_v41  ;;  %v3080_v41 = vld [vmem:[#allocation8 + $0x48] sm:$0xff]  }
 0x122   :  { %1795 = vmatmul.mubr.bf16.vlgmr.msra.gmra.mxu1 %v3342_v12  ;;  %2633 = vmatpush3.bf16.msra.mxu0 %v3069_v48  ;;  %v3079_v12 = vld [vmem:[#allocation8 + $0x10] sm:$0xff]  }
 0x123   :  { %2634 = vmatprep.subr.bf16.mxu0 %v3070_v50  ;;  %2655 = vmatpush3.bf16.msra.mxu1 %v3085_v4  ;;  %v342_v4 = vsub.s32 3, %v329_v18 }
 0x124   :  { %2656 = vmatprep.subr.bf16.mxu1 %v3086_v63  ;;  %v338_v63 = vsub.s32 2, %v329_v18 }
 0x126   :  { %2635 = vmatpush3.bf16.msra.mxu0 %v3071_v52 }
 0x127   :  { %2636 = vmatprep.subr.bf16.mxu0 %v3072_v53  ;;  %2657 = vmatpush3.bf16.msra.mxu1 %v3087_v0  ;;  %v3100_v0 = vld [vmem:[#allocation10 + $0x38] sm:$0xff]  }
 0x128   :  { %2658 = vmatprep.subr.bf16.mxu1 %v3088_v1 }
 0x12a   :  { %2637 = vmatpush3.bf16.msra.mxu0 %v3073_v54 }
 0x12b   :  { %2638 = vmatprep.subr.bf16.mxu0 %v3074_v55  ;;  %2659 = vmatpush3.bf16.msra.mxu1 %v3089_v2 }
 0x12c   :  { %2660 = vmatprep.subr.bf16.mxu1 %v3090_v35  ;;  %v3256_v35 = vmov 0.0  }
 0x12e   :  { %2639 = vmatpush3.bf16.msra.mxu0 %v3075_v56 }
 0x12f   :  { %2640 = vmatprep.subr.bf16.mxu0 %v3076_v57  ;;  %2661 = vmatpush3.bf16.msra.mxu1 %v3091_v3  ;;  %v343_v3 = vrot.slane %v326_v25, %v342_v4 }
 0x130   :  { %2662 = vmatprep.subr.bf16.mxu1 %v3092_v6  ;;  %v3101_v6 = vld [vmem:[#allocation10 + $0x30] sm:$0xff]  }
 0x132   :  { %2641 = vmatpush3.bf16.msra.mxu0 %v3077_v58 }
 0x133   :  { %2642 = vmatprep.subr.bf16.mxu0 %v3078_v59  ;;  %2663 = vmatpush3.bf16.msra.mxu1 %v3093_v7  ;;  %v339_v7 = vrot.slane %v326_v25, %v338_v63  ;;  %v3103_v25 = vld [vmem:[#allocation10 + $0x20] sm:$0xff]  }
 0x134   :  { %2664 = vmatprep.subr.bf16.mxu1 %v3094_v8 }
 0x136   :  { %2643 = vmatpush3.bf16.msra.mxu0 %v3079_v12 }
 0x137   :  { %2644 = vmatprep.subr.bf16.mxu0 %v3080_v41  ;;  %2665 = vmatpush3.bf16.msra.mxu1 %v3095_v9 }
 0x138   :  { %2666 = vmatprep.subr.bf16.mxu1 %v3096_v10 }
 0x13a   :  { %2645 = vmatpush3.bf16.msra.mxu0 %v3081_v49 }
 0x13b   :  { %2646 = vmatprep.subr.bf16.mxu0 %v3082_v60  ;;  %2667 = vmatpush3.bf16.msra.mxu1 %v3097_v11  ;;  %v3102_v11 = vld [vmem:[#allocation10 + $0x28] sm:$0xff]  }
 0x13c   :  { %2668 = vmatprep.subr.bf16.mxu1 %v3098_v13 }
 0x13e   :  { %2647 = vmatpush3.bf16.msra.mxu0 %v3083_v61 }
 0x13f   :  { %2669 = vmatpush3.bf16.msra.mxu1 %v3099_v15  ;;  %2685 = vmatprep.subr.bf16.mxu0 %v3256_v35 }
 0x141   :  { %v1538_v19 = vpop.f32.mrf.mxu0 }
 0x142   :  { %v1581_v17 = vpop.f32.mrf.mxu1  ;;  %v1539_v51 = vadd.f32 %v1538_v19, %v331_v27 }
 0x143   :  { %v1540_v23 = vpop.f32.mrf.mxu0 }
 0x144   :  { %v1583_v20 = vpop.f32.mrf.mxu1  ;;  %v1541_v30 = vadd.f32 %v1540_v23, %v335_v26  ;;  %v1582_v37 = vadd.f32 %v1581_v17, %v1539_v51 }
 0x145   :  { %v1542_v28 = vpop.f32.mrf.mxu0 }
 0x146   :  { %v1585_v24 = vpop.f32.mrf.mxu1  ;;  %v1543_v32 = vadd.f32 %v1542_v28, %v331_v27  ;;  %v1584_v34 = vadd.f32 %v1583_v20, %v1541_v30 }
 0x147   :  { %v1544_v31 = vpop.f32.mrf.mxu0 }
 0x148   :  { %v1587_v29 = vpop.f32.mrf.mxu1  ;;  %v1545_v36 = vadd.f32 %v1544_v31, %v335_v26  ;;  %v1586_v39 = vadd.f32 %v1585_v24, %v1543_v32 }
 0x14a   :  { %v1588_v45 = vadd.f32 %v1587_v29, %v1545_v36 }
 0x162   :  { %v1667_v5 = vpop.f32.mrf.mxu1 }
 0x164   :  { %v1669_v14 = vpop.f32.mrf.mxu1 }
 0x166   :  { %v1671_v42 = vpop.f32.mrf.mxu1 }
 0x168   :  { %v1673_v53 = vpop.f32.mrf.mxu1 }
 0x181   :  { %v1624_v33 = vpop.f32.mrf.mxu0 }
 0x182   :  { %v1625_v43 = vadd.f32 %v1624_v33, %v1582_v37 }
 0x183   :  { %v1626_v38 = vpop.f32.mrf.mxu0 }
 0x184   :  { %v1627_v40 = vadd.f32 %v1626_v38, %v1584_v34  ;;  %v1668_v54 = vadd.f32 %v1667_v5, %v1625_v43  ;;  %v3104_v43 = vld [vmem:[#allocation10 + $0x18] sm:$0xff]  }
 0x185   :  { %v1628_v44 = vpop.f32.mrf.mxu0 }
 0x186   :  { %v1629_v46 = vadd.f32 %v1628_v44, %v1586_v39  ;;  %v1670_v48 = vadd.f32 %v1669_v14, %v1627_v40  ;;  %v1848_v59 = vmax.f32 %v1668_v54, 0.0  ;;  %v3105_v44 = vld [vmem:[#allocation10 + $0x10] sm:$0xff]  }
 0x187   :  { %v1630_v47 = vpop.f32.mrf.mxu0 }
 0x188   :  { %v1672_v50 = vadd.f32 %v1671_v42, %v1629_v46  ;;  %v1631_v52 = vadd.f32 %v1630_v47, %v1588_v45  ;;  %v1849_v57 = vmax.f32 %v1670_v48, 0.0  ;;  %v3106_v45 = vld [vmem:[#allocation10 + $0x8] sm:$0xff]   ;;  %v3107_v46 = vld [vmem:[#allocation10] sm:$0xff]  }
 0x18a   :  { %v1674_v55 = vadd.f32 %v1673_v53, %v1631_v52  ;;  %v1852_v56 = vmax.f32 %v1672_v50, 0.0 }
 0x18c   :  { %v1853_v58 = vmax.f32 %v1674_v55, 0.0  ;;  %v1856_v41 = vpack.c.bf16 %v1852_v56, %v1848_v59  ;;  %v2590_v55 = vld [vmem:[%s3365_s4] ss:$0 sm:$0xff]  ;;  %s3258_s4 = smov [#allocation11]  }
 0x18e   :  { %v1857_v12 = vpack.c.bf16 %v1853_v58, %v1849_v57 }
 0x190   :  { %2155 = vmatprep.mubr.bf16.mxu0 %v1857_v12 }
 0x191   :  { %2156 = vmatmul.mubr.bf16.vlgmr.msra.gmra.mxu0 %v1856_v41 }
 0x192   :  { %2686 = vmatpush3.bf16.msra.mxu0 %v3100_v0  ;;  %2701 = vmatprep.mubr.msk.bf16.mxu0 %vm3257_vm0, %v3256_v35 }
 0x193   :  { %2687 = vmatprep.subr.bf16.mxu0 %v3256_v35 }
 0x196   :  { %2688 = vmatpush3.bf16.msra.mxu0 %v3101_v6 }
 0x197   :  { %2689 = vmatprep.subr.bf16.mxu0 %v3256_v35 }
 0x19a   :  { %2690 = vmatpush3.bf16.msra.mxu0 %v3102_v11 }
 0x19b   :  { %2691 = vmatprep.subr.bf16.mxu0 %v3256_v35 }
 0x19e   :  { %2692 = vmatpush3.bf16.msra.mxu0 %v3103_v25 }
 0x19f   :  { %2693 = vmatprep.subr.bf16.mxu0 %v3256_v35 }
 0x1a2   :  { %v1710_v49 = vpop.f32.mrf.mxu1  ;;  %2694 = vmatpush3.bf16.msra.mxu0 %v3104_v43 }
 0x1a3   :  { %v1711_v13 = vadd.f32 %v1710_v49, %v339_v7  ;;  %2695 = vmatprep.subr.bf16.mxu0 %v3256_v35 }
 0x1a4   :  { %v1712_v61 = vpop.f32.mrf.mxu1 }
 0x1a5   :  { %v1713_v10 = vadd.f32 %v1712_v61, %v343_v3 }
 0x1a6   :  { %v1714_v1 = vpop.f32.mrf.mxu1  ;;  %2696 = vmatpush3.bf16.msra.mxu0 %v3105_v44 }
 0x1a7   :  { %v1715_v17 = vadd.f32 %v1714_v1, %v339_v7  ;;  %2697 = vmatprep.subr.bf16.mxu0 %v3256_v35  ;;  %v2623_v1 = vld [vmem:[%s3367_s6] ss:$0 sm:$0xff]  ;;  %s2345_s6 = sshll.u32 %s3258_s4, 4  ;;  %s2346_s6 = int_to_ptr.vmem [resolvable:$true] %s2345_s6 }
 0x1a8   :  { %v1716_v8 = vpop.f32.mrf.mxu1  ;;  %s3216_s8 = scalar_lea.vmem %s2346_s6, 256  ;;  %p3221_p12 = scmp.lt.s32.totalorder %s2346_s6, %s2346_s6 }
 0x1a9   :  { %v1717_v22 = vadd.f32 %v1716_v8, %v343_v3  ;;  %p3217_p11 = scmp.ne.s32.totalorder %s2346_s6, %s3216_s8  ;;  %p3222_p13 = scmp.lt.s32.totalorder %s3216_s8, %s3216_s8 }
 0x1aa   :  { %2698 = vmatpush3.bf16.msra.mxu0 %v3106_v45 }
 0x1ab   :  { %2699 = vmatprep.subr.bf16.mxu0 %v3256_v35  ;;  %p3223_p0 = por %p3222_p13, %p3221_p12 }
 0x1ad   :  { %p3224_p1 = pnand %p3223_p0, %p3217_p11 }
 0x1ae   :  { %2700 = vmatpush3.bf16.msra.mxu0 %v3107_v46 }
 0x1c1   :  { %v1753_v60 = vpop.f32.mrf.mxu0 }
 0x1c2   :  { %v1754_v19 = vadd.f32 %v1753_v60, %v1711_v13 }
 0x1c3   :  { %v1755_v62 = vpop.f32.mrf.mxu0 }
 0x1c4   :  { %v1756_v18 = vadd.f32 %v1755_v62, %v1713_v10 }
 0x1c5   :  { %v1757_v2 = vpop.f32.mrf.mxu0 }
 0x1c6   :  { %v1758_v23 = vadd.f32 %v1757_v2, %v1715_v17 }
 0x1c7   :  { %v1759_v9 = vpop.f32.mrf.mxu0 }
 0x1c8   :  { %v1760_v29 = vadd.f32 %v1759_v9, %v1717_v22 }
 0x1e1   :  { %v1839_v16 = vpop.f32.mrf.mxu0 }
 0x1e2   :  { %v1796_v15 = vpop.f32.mrf.mxu1 }
 0x1e3   :  { %v1841_v21 = vpop.f32.mrf.mxu0  ;;  %v1797_v26 = vadd.f32 %v1796_v15, %v1754_v19 }
 0x1e4   :  { %v1798_v20 = vpop.f32.mrf.mxu1 }
 0x1e5   :  { %v1799_v24 = vadd.f32 %v1798_v20, %v1756_v18  ;;  %v1843_v28 = vpop.f32.mrf.mxu0  ;;  %v1840_v14 = vadd.f32 %v1839_v16, %v1797_v26 }
 0x1e6   :  { %v1800_v27 = vpop.f32.mrf.mxu1 }
 0x1e7   :  { %v1801_v5 = vadd.f32 %v1800_v27, %v1758_v23  ;;  %v1842_v51 = vadd.f32 %v1841_v21, %v1799_v24  ;;  %v1845_v33 = vpop.f32.mrf.mxu0  ;;  %v1850_v39 = vmax.f32 %v1840_v14, 0.0 }
 0x1e8   :  { %v1802_v30 = vpop.f32.mrf.mxu1 }
 0x1e9   :  { %v1844_v31 = vadd.f32 %v1843_v28, %v1801_v5  ;;  %v1803_v32 = vadd.f32 %v1802_v30, %v1760_v29  ;;  %v1851_v37 = vmax.f32 %v1842_v51, 0.0 }
 0x1eb   :  { %v1846_v34 = vadd.f32 %v1845_v33, %v1803_v32  ;;  %v1854_v36 = vmax.f32 %v1844_v31, 0.0 }
 0x1ed   :  { %v1855_v38 = vmax.f32 %v1846_v34, 0.0  ;;  %v1858_v42 = vpack.c.bf16 %v1854_v36, %v1850_v39 }
 0x1ef   :  { %v1859_v40 = vpack.c.bf16 %v1855_v38, %v1851_v37 }
 0x1f1   :  { %2196 = vmatprep.mubr.bf16.mxu1 %v1859_v40 }
 0x1f2   :  { %2197 = vmatmul.mubr.bf16.vlgmr.msra.gmra.mxu1 %v1858_v42 }
 0x251   :  { %v2648_v47 = vpop.f32.mrf.mxu0 }
 0x253   :  { %v2649_v48 = vpop.f32.mrf.mxu0 }
 0x254   :  { %v2650_v54 = vadd.f32 %v2649_v48, %v2648_v47 }
 0x255   :  { %v2651_v50 = vpop.f32.mrf.mxu0 }
 0x256   :  { %v2158_v12 = vadd.f32 %v2650_v54, %v2590_v55 }
 0x257   :  { %v2652_v52 = vpop.f32.mrf.mxu0 }
 0x258   :  { %v2653_v57 = vadd.f32 %v2652_v52, %v2651_v50 }
 0x25a   :  { %v2161_v49 = vadd.f32 %v2653_v57, %v2590_v55 }
 0x2b2   :  { %v2670_v53 = vpop.f32.mrf.mxu1 }
 0x2b4   :  { %v2671_v56 = vpop.f32.mrf.mxu1 }
 0x2b5   :  { %v2672_v58 = vadd.f32 %v2671_v56, %v2670_v53 }
 0x2b6   :  { %v2673_v59 = vpop.f32.mrf.mxu1 }
 0x2b7   :  { %v2199_v60 = vadd.f32 %v2672_v58, %v2158_v12 }
 0x2b8   :  { %v2674_v41 = vpop.f32.mrf.mxu1 }
 0x2b9   :  { %v2675_v61 = vadd.f32 %v2674_v41, %v2673_v59  ;;  %v2205_v4 = vmax.f32 %v2199_v60, 0.0 }
 0x2bb   :  { %v2202_v62 = vadd.f32 %v2675_v61, %v2161_v49 }
 0x2bd   :  { %v2206_v63 = vmax.f32 %v2202_v62, 0.0 }
 0x2bf   :  { %v2207_v0 = vpack.c.bf16 %v2206_v63, %v2205_v4 }
 0x2c1   :  { %2702 = vmatmul.mubr.bf16.vlgmr.msra.gmra.mxu0 %v2207_v0 }
 0x381   :  { %v2313_v2 = vpop.f32.mrf.mxu0 }
 0x382   :  { %v2314_v35 = vadd.f32 %v2623_v1, %v2313_v2 }
 0x383   :  { %v2703_v3 = vpop.f32.mrf.mxu0 }
 0x384   :  { %2320 = vmax.xlane.f32.xlu0 %v2314_v35 }
 0x385   :  { %v2316_v6 = vpop.f32.mrf.mxu0 }
 0x386   :  { %v2317_v7 = vadd.f32 %v2623_v1, %v2316_v6 }
 0x387   :  { %v2704_v8 = vpop.f32.mrf.mxu0 }
 0x388   :  { %2322 = vmax.xlane.f32.xlu0 %v2317_v7 }
 0x40d   :  { %v2321_v9 = vpop.xlane.xlu0 %2320 }
 0x40e   :  { %v2324_v10 = vsub.f32 %v2314_v35, %v2321_v9 }
 0x410   :  { %v2326_v11 = vmul.f32 1.442695, %v2324_v10 }
 0x411   :  { %v2323_v13 = vpop.xlane.xlu0 %2322 }
 0x412   :  { %3108 = vpow2.f32 %v2326_v11  ;;  %v2325_v15 = vsub.f32 %v2317_v7, %v2323_v13 }
 0x414   :  { %v2328_v16 = vmul.f32 1.442695, %v2325_v15 }
 0x416   :  { %3110 = vpow2.f32 %v2328_v16 }
 0x41f   :  { %v3109_v17 = vpop.eup %3108 }
 0x420   :  { %2330 = vadd.xlane.f32.xlu1 %v3109_v17 }
 0x423   :  { %v3111_v18 = vpop.eup %3110 }
 0x424   :  { %2332 = vadd.xlane.f32.xlu1 %v3111_v18 }
 0x4a9   :  { %v2331_v19 = vpop.xlane.xlu1 %2330 }
 0x4aa   :  { %3112 = vrcp.f32 %v2331_v19 }
 0x4ad   :  { %v2333_v20 = vpop.xlane.xlu1 %2332 }
 0x4ae   :  { %3114 = vrcp.f32 %v2333_v20 }
 0x4b7   :  { %v3113_v21 = vpop.eup %3112 }
 0x4b8   :  { %v2336_v22 = vmul.f32 %v3113_v21, %v3109_v17 }
 0x4ba   :  { %2338 = vst [vmem:[#allocation11] sm:$0xff] %v2336_v22 }
 0x4bb   :  { %v3115_v23 = vpop.eup %3114 }
 0x4bc   :  { %v2337_v24 = vmul.f32 %v3115_v23, %v3111_v18 }
 0x4be   :  { %2339 = vst [vmem:[#allocation11 + $0x8] sm:$0xff] %v2337_v24 }
 0x4bf   :  { %3227 = shalt.err (!%p3224_p1)
}
 0x4c0   :  { %s3259_s9 = smov 128   ;;  %s3260_s10 = smov 8  }
 0x4c1   :  { %2351 = dma.vmem_to_hbm [thread:$0]  %s2346_s6, 256, %s3368_s7, [#allocation4], %s3259_s9, %s3259_s9, %s3260_s10  }
 0x4c2   :  { %3242 = dma.done.wait [#allocation4], 256  }
 0x4c3   :  { %3243 = vsyncadd [#allocation4], 4294967040 }
 0x4c4   :  { %2355 = vsyncpa [#allocation3], 1 }
 0x4c5   :  { %2356 = vsyncpa [#allocation6], 1 }
 0x4c6   :  { %2357 = vsyncpa [#allocation9], 1 }
 0x4c7   :  { %2358 = vsyncpa [#allocation4], 1 }

</bundles_post_ra>
